<compile_context>
chip_gen: v5e
topology: v5e:2x2
jax: 0.10.0
libtpu: 0.0.40
codegen_flags: <defaults>
</compile_context>

<pallas_src>
import functools

import jax
import jax.numpy as jnp
from jax.experimental import pallas as pl
from jax.experimental.pallas import tpu as pltpu


# ----------------------------------------------------------------------------
# Fused Pallas kernel: 12 x (BN -> GraphConv -> ReLU) + global_mean_pool
# ----------------------------------------------------------------------------
def _fused_gnn_kernel(x0_ref, a_ref, wrel_ref, wroot_ref, p3_ref, pool_ref, o_ref,
                      *, eps, num_layers, mxu_dtype):
    """Single-invocation fused forward.

    x0_ref   : [N, F]    f32  initial node features (layer-0 input, zero-padded to F)
    a_ref    : [N, N]    f32  row-normalized (mean) adjacency
    wrel_ref : [L, F, F] mxu  stacked W_rel^T   (f_in zero-padded to F)
    wroot_ref: [L, F, F] mxu  stacked W_root^T
    p3_ref   : [L, 3, F] f32  stacked [gamma; beta; bias]
    pool_ref : [G, N]    f32  global_mean_pool matrix
    o_ref    : [G, F]    f32  pooled graph embeddings
    """
    x = x0_ref[...]                                    # [N, F] f32, stays on-chip
    a = a_ref[...].astype(mxu_dtype)                   # [N, N] MXU operand

    for li in range(num_layers):                       # statically unrolled layer loop
        # --- BatchNorm1d over the node axis (training-mode batch stats, biased var), f32 ---
        p = p3_ref[li]                                 # [3, F] f32 (static index -> view)
        mean = jnp.mean(x, axis=0, keepdims=True)
        centered = x - mean
        var = jnp.mean(centered * centered, axis=0, keepdims=True)
        xbn = centered * jax.lax.rsqrt(var + eps) * p[0:1, :] + p[1:2, :]

        # --- GraphConv(aggr='mean'): W_rel @ mean_j x_j + b_rel + W_root @ x_i ---
        xbn_m = xbn.astype(mxu_dtype)
        agg = jnp.dot(a, xbn_m, preferred_element_type=jnp.float32)        # [N, F]
        out = (jnp.dot(agg.astype(mxu_dtype), wrel_ref[li],
                       preferred_element_type=jnp.float32)
               + jnp.dot(xbn_m, wroot_ref[li],
                         preferred_element_type=jnp.float32)
               + p[2:3, :])

        # ReLU on every layer except the last (the last layer feeds the pool pre-ReLU).
        x = jnp.maximum(out, 0.0) if li < num_layers - 1 else out

    # --- global_mean_pool as a dense matmul (tiny; kept in f32 for accuracy) ---
    o_ref[...] = jnp.dot(pool_ref[...], x,
                         preferred_element_type=jnp.float32).astype(o_ref.dtype)


# ----------------------------------------------------------------------------
# Plain-JAX glue: graph -> dense operators, parameter stacking / padding
# ----------------------------------------------------------------------------
def build_mean_adjacency(edge_index, num_nodes):
    """A_mean[i, j] = count(j->i) / in_degree(i); rows with no incoming edges are 0."""
    src, dst = edge_index[0], edge_index[1]
    adj = jnp.zeros((num_nodes, num_nodes), jnp.float32).at[dst, src].add(1.0)
    deg = adj.sum(axis=1, keepdims=True)
    return jnp.where(deg > 0, adj / jnp.maximum(deg, 1.0), 0.0)


def build_pool_matrix(batch, num_graphs, num_nodes):
    onehot = (batch[None, :] == jnp.arange(num_graphs)[:, None]).astype(jnp.float32)
    counts = onehot.sum(axis=1, keepdims=True)
    return onehot / jnp.maximum(counts, 1.0)


def init_params(key, num_node_features, hidden_channels, num_layers=12):
    """Deterministic synthetic parameters matching the module's shapes."""
    params = []
    f_in = num_node_features
    for _ in range(num_layers):
        f_out = hidden_channels
        key, k1, k2, k3, k4, k5 = jax.random.split(key, 6)
        params.append(dict(
            w_rel_t=0.1 * jax.random.normal(k1, (f_in, f_out), jnp.float32),
            w_root_t=0.1 * jax.random.normal(k2, (f_in, f_out), jnp.float32),
            b_rel=0.1 * jax.random.normal(k3, (1, f_out), jnp.float32),
            gamma=1.0 + 0.1 * jax.random.normal(k4, (1, f_in), jnp.float32),
            beta=0.1 * jax.random.normal(k5, (1, f_in), jnp.float32),
        ))
        f_in = f_out
    return params


def _stack_params(params, f_pad, mxu_dtype):
    """Stack per-layer params into [L, ...] arrays at the hidden width f_pad.

    Padded gamma/beta/bias/weight entries are zero, so padded columns stay exactly 0
    through BN, aggregation, the linear map and ReLU.
    """
    num_layers = len(params)
    w_rel = jnp.zeros((num_layers, f_pad, f_pad), jnp.float32)
    w_root = jnp.zeros((num_layers, f_pad, f_pad), jnp.float32)
    p3 = jnp.zeros((num_layers, 3, f_pad), jnp.float32)
    for li, p in enumerate(params):
        f_in, f_out = p["w_rel_t"].shape
        w_rel = w_rel.at[li, :f_in, :f_out].set(p["w_rel_t"])
        w_root = w_root.at[li, :f_in, :f_out].set(p["w_root_t"])
        p3 = p3.at[li, 0, :f_in].set(p["gamma"][0])
        p3 = p3.at[li, 1, :f_in].set(p["beta"][0])
        p3 = p3.at[li, 2, :f_out].set(p["b_rel"][0])
    return w_rel.astype(mxu_dtype), w_root.astype(mxu_dtype), p3


def gnn_forward(x, edge_index, batch, params, num_graphs, *, eps=1e-5,
                mxu_dtype=jnp.bfloat16):
    """Fused forward: one grid-less pallas_call for all layers + pooling."""
    n, f0 = x.shape
    num_layers = len(params)
    f_hidden = params[0]["w_rel_t"].shape[1]
    f_pad = max(f0, f_hidden)          # pad the narrow layer-0 input up to the hidden width

    a_mean = build_mean_adjacency(edge_index, n)
    p_pool = build_pool_matrix(batch, num_graphs, n)
    x_pad = jnp.zeros((n, f_pad), jnp.float32).at[:, :f0].set(x)
    w_rel, w_root, p3 = _stack_params(params, f_pad, mxu_dtype)

    kernel = functools.partial(_fused_gnn_kernel, eps=eps, num_layers=num_layers,
                               mxu_dtype=mxu_dtype)
    vmem_spec = pl.BlockSpec(memory_space=pltpu.MemorySpace.VMEM)
    out = pl.pallas_call(
        kernel,
        out_shape=jax.ShapeDtypeStruct((num_graphs, f_pad), jnp.float32),
        in_specs=[vmem_spec] * 6,      # full arrays, each DMA'd into VMEM exactly once
        out_specs=vmem_spec,
    )(x_pad, a_mean, w_rel, w_root, p3, p_pool)
    return out[:, :f_hidden]


# ----------------------------------------------------------------------------
# Pure-JAX reference (same math, unpadded).  mxu_dtype=float32 gives the exact
# module semantics; mxu_dtype=bfloat16 mirrors the kernel's MXU-operand casts.
# ----------------------------------------------------------------------------
def gnn_forward_ref(x, edge_index, batch, params, num_graphs, *, eps=1e-5,
                    mxu_dtype=jnp.float32):
    n = x.shape[0]
    a_mean = build_mean_adjacency(edge_index, n).astype(mxu_dtype)
    p_pool = build_pool_matrix(batch, num_graphs, n)
    num_layers = len(params)
    for li, p in enumerate(params):
        mean = x.mean(axis=0, keepdims=True)
        centered = x - mean
        var = (centered * centered).mean(axis=0, keepdims=True)
        xbn = centered * jax.lax.rsqrt(var + eps) * p["gamma"] + p["beta"]
        xbn_m = xbn.astype(mxu_dtype)
        agg = jnp.dot(a_mean, xbn_m, preferred_element_type=jnp.float32)
        out = (jnp.dot(agg.astype(mxu_dtype), p["w_rel_t"].astype(mxu_dtype),
                       preferred_element_type=jnp.float32)
               + jnp.dot(xbn_m, p["w_root_t"].astype(mxu_dtype),
                         preferred_element_type=jnp.float32)
               + p["b_rel"])
        x = jnp.maximum(out, 0.0) if li < num_layers - 1 else out
    return jnp.dot(p_pool, x, preferred_element_type=jnp.float32)


# ----------------------------------------------------------------------------
if __name__ == "__main__":
    NUM_NODE_FEATURES = 8
    HIDDEN_CHANNELS = 32
    NUM_NODES = 16
    NUM_GRAPHS = 2
    NUM_EDGES = 40
    NUM_LAYERS = 12

    key = jax.random.PRNGKey(0)
    kx, ke, kp = jax.random.split(key, 3)

    x = jax.random.normal(kx, (NUM_NODES, NUM_NODE_FEATURES), jnp.float32)
    edge_index = jax.random.randint(ke, (2, NUM_EDGES), 0, NUM_NODES, jnp.int32)
    # batch assignment: first half of nodes -> graph 0, second half -> graph 1
    batch = (jnp.arange(NUM_NODES) >= NUM_NODES // 2).astype(jnp.int32)

    params = init_params(kp, NUM_NODE_FEATURES, HIDDEN_CHANNELS, num_layers=NUM_LAYERS)

    out = gnn_forward(x, edge_index, batch, params, NUM_GRAPHS, mxu_dtype=jnp.bfloat16)
    out = jax.block_until_ready(out)
    assert out.shape == (NUM_GRAPHS, HIDDEN_CHANNELS)

    # (a) Kernel vs a pure-JAX reference that mirrors the bf16 MXU-operand casts (tight).
    ref_bf16 = gnn_forward_ref(x, edge_index, batch, params, NUM_GRAPHS,
                               mxu_dtype=jnp.bfloat16)
    assert jnp.allclose(out, ref_bf16, atol=5e-3, rtol=5e-3), \
        "Pallas output mismatch vs bf16-mirrored reference"

    # (b) Kernel vs the full-f32 module semantics (bf16 MXU operands => relaxed tolerance).
    ref_f32 = gnn_forward_ref(x, edge_index, batch, params, NUM_GRAPHS,
                              mxu_dtype=jnp.float32)
    assert jnp.allclose(out, ref_f32, atol=5e-2, rtol=5e-2), \
        "Pallas output drifted too far from the f32 reference"

    print("KERNEL_OK")
</pallas_src>

<mosaic_0001>
module attributes {stable_mosaic.version = 11 : i64} {
  func.func @_fused_gnn_kernel(%arg0: memref<16x32xf32, #tpu.memory_space<vmem>>, %arg1: memref<16x16xf32, #tpu.memory_space<vmem>>, %arg2: memref<12x32x32xbf16, #tpu.memory_space<vmem>>, %arg3: memref<12x32x32xbf16, #tpu.memory_space<vmem>>, %arg4: memref<12x3x32xf32, #tpu.memory_space<vmem>>, %arg5: memref<2x16xf32, #tpu.memory_space<vmem>>, %arg6: memref<2x32xf32, #tpu.memory_space<vmem>>) attributes {dimension_semantics = [], scalar_prefetch = 0 : i64, scratch_operands = 0 : i64, tpu.core_type = #tpu.core_type<tc>} {
    %c0 = arith.constant 0 : index
    %c0_0 = arith.constant 0 : index
    %0 = vector.load %arg0[%c0, %c0_0] : memref<16x32xf32, #tpu.memory_space<vmem>>, vector<16x32xf32>
    %c0_1 = arith.constant 0 : index
    %c0_2 = arith.constant 0 : index
    %1 = vector.load %arg1[%c0_1, %c0_2] : memref<16x16xf32, #tpu.memory_space<vmem>>, vector<16x16xf32>
    %2 = arith.truncf %1 : vector<16x16xf32> to vector<16x16xbf16>
    %c0_3 = arith.constant 0 : index
    %c0_4 = arith.constant 0 : index
    %c0_5 = arith.constant 0 : index
    %3 = vector.load %arg4[%c0_3, %c0_4, %c0_5] : memref<12x3x32xf32, #tpu.memory_space<vmem>>, vector<1x3x32xf32>
    %4 = vector.shape_cast %3 : vector<1x3x32xf32> to vector<3x32xf32>
    %cst = arith.constant dense<0.000000e+00> : vector<32xf32>
    %5 = vector.multi_reduction <add>, %0, %cst [0] : vector<16x32xf32> to vector<32xf32>
    %6 = vector.shape_cast %5 : vector<32xf32> to vector<1x32xf32>
    %cst_6 = arith.constant 1.600000e+01 : f32
    %7 = vector.broadcast %cst_6 : f32 to vector<1x32xf32>
    %8 = arith.divf %6, %7 : vector<1x32xf32>
    %9 = vector.broadcast %8 : vector<1x32xf32> to vector<16x32xf32>
    %10 = arith.subf %0, %9 : vector<16x32xf32>
    %11 = arith.mulf %10, %10 : vector<16x32xf32>
    %cst_7 = arith.constant dense<0.000000e+00> : vector<32xf32>
    %12 = vector.multi_reduction <add>, %11, %cst_7 [0] : vector<16x32xf32> to vector<32xf32>
    %13 = vector.shape_cast %12 : vector<32xf32> to vector<1x32xf32>
    %cst_8 = arith.constant 1.600000e+01 : f32
    %14 = vector.broadcast %cst_8 : f32 to vector<1x32xf32>
    %15 = arith.divf %13, %14 : vector<1x32xf32>
    %cst_9 = arith.constant 9.99999974E-6 : f32
    %16 = vector.broadcast %cst_9 : f32 to vector<1x32xf32>
    %17 = arith.addf %15, %16 : vector<1x32xf32>
    %18 = math.rsqrt %17 : vector<1x32xf32>
    %19 = vector.broadcast %18 : vector<1x32xf32> to vector<16x32xf32>
    %20 = arith.mulf %10, %19 : vector<16x32xf32>
    %21 = vector.extract_strided_slice %4 {offsets = [0, 0], sizes = [1, 32], strides = [1, 1]} : vector<3x32xf32> to vector<1x32xf32>
    %22 = vector.broadcast %21 : vector<1x32xf32> to vector<16x32xf32>
    %23 = arith.mulf %20, %22 : vector<16x32xf32>
    %24 = vector.extract_strided_slice %4 {offsets = [1, 0], sizes = [1, 32], strides = [1, 1]} : vector<3x32xf32> to vector<1x32xf32>
    %25 = vector.broadcast %24 : vector<1x32xf32> to vector<16x32xf32>
    %26 = arith.addf %23, %25 : vector<16x32xf32>
    %27 = arith.truncf %26 : vector<16x32xf32> to vector<16x32xbf16>
    %cst_10 = arith.constant dense<0.000000e+00> : vector<16x32xf32>
    %28 = tpu.matmul %2, %27, %cst_10 {dimension_numbers = #tpu.dot_dimension_numbers<[1], [0], [0], [1], [0, 0, 1, 1], [], []>} : vector<16x16xbf16>, vector<16x32xbf16>, vector<16x32xf32> -> vector<16x32xf32>
    %29 = arith.truncf %28 : vector<16x32xf32> to vector<16x32xbf16>
    %c0_11 = arith.constant 0 : index
    %c0_12 = arith.constant 0 : index
    %c0_13 = arith.constant 0 : index
    %30 = vector.load %arg2[%c0_11, %c0_12, %c0_13] : memref<12x32x32xbf16, #tpu.memory_space<vmem>>, vector<1x32x32xbf16>
    %31 = vector.shape_cast %30 : vector<1x32x32xbf16> to vector<32x32xbf16>
    %cst_14 = arith.constant dense<0.000000e+00> : vector<16x32xf32>
    %32 = tpu.matmul %29, %31, %cst_14 {dimension_numbers = #tpu.dot_dimension_numbers<[1], [0], [0], [1], [0, 0, 1, 1], [], []>} : vector<16x32xbf16>, vector<32x32xbf16>, vector<16x32xf32> -> vector<16x32xf32>
    %c0_15 = arith.constant 0 : index
    %c0_16 = arith.constant 0 : index
    %c0_17 = arith.constant 0 : index
    %33 = vector.load %arg3[%c0_15, %c0_16, %c0_17] : memref<12x32x32xbf16, #tpu.memory_space<vmem>>, vector<1x32x32xbf16>
    %34 = vector.shape_cast %33 : vector<1x32x32xbf16> to vector<32x32xbf16>
    %cst_18 = arith.constant dense<0.000000e+00> : vector<16x32xf32>
    %35 = tpu.matmul %27, %34, %cst_18 {dimension_numbers = #tpu.dot_dimension_numbers<[1], [0], [0], [1], [0, 0, 1, 1], [], []>} : vector<16x32xbf16>, vector<32x32xbf16>, vector<16x32xf32> -> vector<16x32xf32>
    %36 = arith.addf %32, %35 : vector<16x32xf32>
    %37 = vector.extract_strided_slice %4 {offsets = [2, 0], sizes = [1, 32], strides = [1, 1]} : vector<3x32xf32> to vector<1x32xf32>
    %38 = vector.broadcast %37 : vector<1x32xf32> to vector<16x32xf32>
    %39 = arith.addf %36, %38 : vector<16x32xf32>
    %cst_19 = arith.constant 0.000000e+00 : f32
    %40 = vector.broadcast %cst_19 : f32 to vector<16x32xf32>
    %41 = arith.maximumf %39, %40 : vector<16x32xf32>
    %c1 = arith.constant 1 : index
    %c0_20 = arith.constant 0 : index
    %c0_21 = arith.constant 0 : index
    %42 = vector.load %arg4[%c1, %c0_20, %c0_21] : memref<12x3x32xf32, #tpu.memory_space<vmem>>, vector<1x3x32xf32>
    %43 = vector.shape_cast %42 : vector<1x3x32xf32> to vector<3x32xf32>
    %cst_22 = arith.constant dense<0.000000e+00> : vector<32xf32>
    %44 = vector.multi_reduction <add>, %41, %cst_22 [0] : vector<16x32xf32> to vector<32xf32>
    %45 = vector.shape_cast %44 : vector<32xf32> to vector<1x32xf32>
    %cst_23 = arith.constant 1.600000e+01 : f32
    %46 = vector.broadcast %cst_23 : f32 to vector<1x32xf32>
    %47 = arith.divf %45, %46 : vector<1x32xf32>
    %48 = vector.broadcast %47 : vector<1x32xf32> to vector<16x32xf32>
    %49 = arith.subf %41, %48 : vector<16x32xf32>
    %50 = arith.mulf %49, %49 : vector<16x32xf32>
    %cst_24 = arith.constant dense<0.000000e+00> : vector<32xf32>
    %51 = vector.multi_reduction <add>, %50, %cst_24 [0] : vector<16x32xf32> to vector<32xf32>
    %52 = vector.shape_cast %51 : vector<32xf32> to vector<1x32xf32>
    %cst_25 = arith.constant 1.600000e+01 : f32
    %53 = vector.broadcast %cst_25 : f32 to vector<1x32xf32>
    %54 = arith.divf %52, %53 : vector<1x32xf32>
    %cst_26 = arith.constant 9.99999974E-6 : f32
    %55 = vector.broadcast %cst_26 : f32 to vector<1x32xf32>
    %56 = arith.addf %54, %55 : vector<1x32xf32>
    %57 = math.rsqrt %56 : vector<1x32xf32>
    %58 = vector.broadcast %57 : vector<1x32xf32> to vector<16x32xf32>
    %59 = arith.mulf %49, %58 : vector<16x32xf32>
    %60 = vector.extract_strided_slice %43 {offsets = [0, 0], sizes = [1, 32], strides = [1, 1]} : vector<3x32xf32> to vector<1x32xf32>
    %61 = vector.broadcast %60 : vector<1x32xf32> to vector<16x32xf32>
    %62 = arith.mulf %59, %61 : vector<16x32xf32>
    %63 = vector.extract_strided_slice %43 {offsets = [1, 0], sizes = [1, 32], strides = [1, 1]} : vector<3x32xf32> to vector<1x32xf32>
    %64 = vector.broadcast %63 : vector<1x32xf32> to vector<16x32xf32>
    %65 = arith.addf %62, %64 : vector<16x32xf32>
    %66 = arith.truncf %65 : vector<16x32xf32> to vector<16x32xbf16>
    %cst_27 = arith.constant dense<0.000000e+00> : vector<16x32xf32>
    %67 = tpu.matmul %2, %66, %cst_27 {dimension_numbers = #tpu.dot_dimension_numbers<[1], [0], [0], [1], [0, 0, 1, 1], [], []>} : vector<16x16xbf16>, vector<16x32xbf16>, vector<16x32xf32> -> vector<16x32xf32>
    %68 = arith.truncf %67 : vector<16x32xf32> to vector<16x32xbf16>
    %c1_28 = arith.constant 1 : index
    %c0_29 = arith.constant 0 : index
    %c0_30 = arith.constant 0 : index
    %69 = vector.load %arg2[%c1_28, %c0_29, %c0_30] : memref<12x32x32xbf16, #tpu.memory_space<vmem>>, vector<1x32x32xbf16>
    %70 = vector.shape_cast %69 : vector<1x32x32xbf16> to vector<32x32xbf16>
    %cst_31 = arith.constant dense<0.000000e+00> : vector<16x32xf32>
    %71 = tpu.matmul %68, %70, %cst_31 {dimension_numbers = #tpu.dot_dimension_numbers<[1], [0], [0], [1], [0, 0, 1, 1], [], []>} : vector<16x32xbf16>, vector<32x32xbf16>, vector<16x32xf32> -> vector<16x32xf32>
    %c1_32 = arith.constant 1 : index
    %c0_33 = arith.constant 0 : index
    %c0_34 = arith.constant 0 : index
    %72 = vector.load %arg3[%c1_32, %c0_33, %c0_34] : memref<12x32x32xbf16, #tpu.memory_space<vmem>>, vector<1x32x32xbf16>
    %73 = vector.shape_cast %72 : vector<1x32x32xbf16> to vector<32x32xbf16>
    %cst_35 = arith.constant dense<0.000000e+00> : vector<16x32xf32>
    %74 = tpu.matmul %66, %73, %cst_35 {dimension_numbers = #tpu.dot_dimension_numbers<[1], [0], [0], [1], [0, 0, 1, 1], [], []>} : vector<16x32xbf16>, vector<32x32xbf16>, vector<16x32xf32> -> vector<16x32xf32>
    %75 = arith.addf %71, %74 : vector<16x32xf32>
    %76 = vector.extract_strided_slice %43 {offsets = [2, 0], sizes = [1, 32], strides = [1, 1]} : vector<3x32xf32> to vector<1x32xf32>
    %77 = vector.broadcast %76 : vector<1x32xf32> to vector<16x32xf32>
    %78 = arith.addf %75, %77 : vector<16x32xf32>
    %cst_36 = arith.constant 0.000000e+00 : f32
    %79 = vector.broadcast %cst_36 : f32 to vector<16x32xf32>
    %80 = arith.maximumf %78, %79 : vector<16x32xf32>
    %c2 = arith.constant 2 : index
    %c0_37 = arith.constant 0 : index
    %c0_38 = arith.constant 0 : index
    %81 = vector.load %arg4[%c2, %c0_37, %c0_38] : memref<12x3x32xf32, #tpu.memory_space<vmem>>, vector<1x3x32xf32>
    %82 = vector.shape_cast %81 : vector<1x3x32xf32> to vector<3x32xf32>
    %cst_39 = arith.constant dense<0.000000e+00> : vector<32xf32>
    %83 = vector.multi_reduction <add>, %80, %cst_39 [0] : vector<16x32xf32> to vector<32xf32>
    %84 = vector.shape_cast %83 : vector<32xf32> to vector<1x32xf32>
    %cst_40 = arith.constant 1.600000e+01 : f32
    %85 = vector.broadcast %cst_40 : f32 to vector<1x32xf32>
    %86 = arith.divf %84, %85 : vector<1x32xf32>
    %87 = vector.broadcast %86 : vector<1x32xf32> to vector<16x32xf32>
    %88 = arith.subf %80, %87 : vector<16x32xf32>
    %89 = arith.mulf %88, %88 : vector<16x32xf32>
    %cst_41 = arith.constant dense<0.000000e+00> : vector<32xf32>
    %90 = vector.multi_reduction <add>, %89, %cst_41 [0] : vector<16x32xf32> to vector<32xf32>
    %91 = vector.shape_cast %90 : vector<32xf32> to vector<1x32xf32>
    %cst_42 = arith.constant 1.600000e+01 : f32
    %92 = vector.broadcast %cst_42 : f32 to vector<1x32xf32>
    %93 = arith.divf %91, %92 : vector<1x32xf32>
    %cst_43 = arith.constant 9.99999974E-6 : f32
    %94 = vector.broadcast %cst_43 : f32 to vector<1x32xf32>
    %95 = arith.addf %93, %94 : vector<1x32xf32>
    %96 = math.rsqrt %95 : vector<1x32xf32>
    %97 = vector.broadcast %96 : vector<1x32xf32> to vector<16x32xf32>
    %98 = arith.mulf %88, %97 : vector<16x32xf32>
    %99 = vector.extract_strided_slice %82 {offsets = [0, 0], sizes = [1, 32], strides = [1, 1]} : vector<3x32xf32> to vector<1x32xf32>
    %100 = vector.broadcast %99 : vector<1x32xf32> to vector<16x32xf32>
    %101 = arith.mulf %98, %100 : vector<16x32xf32>
    %102 = vector.extract_strided_slice %82 {offsets = [1, 0], sizes = [1, 32], strides = [1, 1]} : vector<3x32xf32> to vector<1x32xf32>
    %103 = vector.broadcast %102 : vector<1x32xf32> to vector<16x32xf32>
    %104 = arith.addf %101, %103 : vector<16x32xf32>
    %105 = arith.truncf %104 : vector<16x32xf32> to vector<16x32xbf16>
    %cst_44 = arith.constant dense<0.000000e+00> : vector<16x32xf32>
    %106 = tpu.matmul %2, %105, %cst_44 {dimension_numbers = #tpu.dot_dimension_numbers<[1], [0], [0], [1], [0, 0, 1, 1], [], []>} : vector<16x16xbf16>, vector<16x32xbf16>, vector<16x32xf32> -> vector<16x32xf32>
    %107 = arith.truncf %106 : vector<16x32xf32> to vector<16x32xbf16>
    %c2_45 = arith.constant 2 : index
    %c0_46 = arith.constant 0 : index
    %c0_47 = arith.constant 0 : index
    %108 = vector.load %arg2[%c2_45, %c0_46, %c0_47] : memref<12x32x32xbf16, #tpu.memory_space<vmem>>, vector<1x32x32xbf16>
    %109 = vector.shape_cast %108 : vector<1x32x32xbf16> to vector<32x32xbf16>
    %cst_48 = arith.constant dense<0.000000e+00> : vector<16x32xf32>
    %110 = tpu.matmul %107, %109, %cst_48 {dimension_numbers = #tpu.dot_dimension_numbers<[1], [0], [0], [1], [0, 0, 1, 1], [], []>} : vector<16x32xbf16>, vector<32x32xbf16>, vector<16x32xf32> -> vector<16x32xf32>
    %c2_49 = arith.constant 2 : index
    %c0_50 = arith.constant 0 : index
    %c0_51 = arith.constant 0 : index
    %111 = vector.load %arg3[%c2_49, %c0_50, %c0_51] : memref<12x32x32xbf16, #tpu.memory_space<vmem>>, vector<1x32x32xbf16>
    %112 = vector.shape_cast %111 : vector<1x32x32xbf16> to vector<32x32xbf16>
    %cst_52 = arith.constant dense<0.000000e+00> : vector<16x32xf32>
    %113 = tpu.matmul %105, %112, %cst_52 {dimension_numbers = #tpu.dot_dimension_numbers<[1], [0], [0], [1], [0, 0, 1, 1], [], []>} : vector<16x32xbf16>, vector<32x32xbf16>, vector<16x32xf32> -> vector<16x32xf32>
    %114 = arith.addf %110, %113 : vector<16x32xf32>
    %115 = vector.extract_strided_slice %82 {offsets = [2, 0], sizes = [1, 32], strides = [1, 1]} : vector<3x32xf32> to vector<1x32xf32>
    %116 = vector.broadcast %115 : vector<1x32xf32> to vector<16x32xf32>
    %117 = arith.addf %114, %116 : vector<16x32xf32>
    %cst_53 = arith.constant 0.000000e+00 : f32
    %118 = vector.broadcast %cst_53 : f32 to vector<16x32xf32>
    %119 = arith.maximumf %117, %118 : vector<16x32xf32>
    %c3 = arith.constant 3 : index
    %c0_54 = arith.constant 0 : index
    %c0_55 = arith.constant 0 : index
    %120 = vector.load %arg4[%c3, %c0_54, %c0_55] : memref<12x3x32xf32, #tpu.memory_space<vmem>>, vector<1x3x32xf32>
    %121 = vector.shape_cast %120 : vector<1x3x32xf32> to vector<3x32xf32>
    %cst_56 = arith.constant dense<0.000000e+00> : vector<32xf32>
    %122 = vector.multi_reduction <add>, %119, %cst_56 [0] : vector<16x32xf32> to vector<32xf32>
    %123 = vector.shape_cast %122 : vector<32xf32> to vector<1x32xf32>
    %cst_57 = arith.constant 1.600000e+01 : f32
    %124 = vector.broadcast %cst_57 : f32 to vector<1x32xf32>
    %125 = arith.divf %123, %124 : vector<1x32xf32>
    %126 = vector.broadcast %125 : vector<1x32xf32> to vector<16x32xf32>
    %127 = arith.subf %119, %126 : vector<16x32xf32>
    %128 = arith.mulf %127, %127 : vector<16x32xf32>
    %cst_58 = arith.constant dense<0.000000e+00> : vector<32xf32>
    %129 = vector.multi_reduction <add>, %128, %cst_58 [0] : vector<16x32xf32> to vector<32xf32>
    %130 = vector.shape_cast %129 : vector<32xf32> to vector<1x32xf32>
    %cst_59 = arith.constant 1.600000e+01 : f32
    %131 = vector.broadcast %cst_59 : f32 to vector<1x32xf32>
    %132 = arith.divf %130, %131 : vector<1x32xf32>
    %cst_60 = arith.constant 9.99999974E-6 : f32
    %133 = vector.broadcast %cst_60 : f32 to vector<1x32xf32>
    %134 = arith.addf %132, %133 : vector<1x32xf32>
    %135 = math.rsqrt %134 : vector<1x32xf32>
    %136 = vector.broadcast %135 : vector<1x32xf32> to vector<16x32xf32>
    %137 = arith.mulf %127, %136 : vector<16x32xf32>
    %138 = vector.extract_strided_slice %121 {offsets = [0, 0], sizes = [1, 32], strides = [1, 1]} : vector<3x32xf32> to vector<1x32xf32>
    %139 = vector.broadcast %138 : vector<1x32xf32> to vector<16x32xf32>
    %140 = arith.mulf %137, %139 : vector<16x32xf32>
    %141 = vector.extract_strided_slice %121 {offsets = [1, 0], sizes = [1, 32], strides = [1, 1]} : vector<3x32xf32> to vector<1x32xf32>
    %142 = vector.broadcast %141 : vector<1x32xf32> to vector<16x32xf32>
    %143 = arith.addf %140, %142 : vector<16x32xf32>
    %144 = arith.truncf %143 : vector<16x32xf32> to vector<16x32xbf16>
    %cst_61 = arith.constant dense<0.000000e+00> : vector<16x32xf32>
    %145 = tpu.matmul %2, %144, %cst_61 {dimension_numbers = #tpu.dot_dimension_numbers<[1], [0], [0], [1], [0, 0, 1, 1], [], []>} : vector<16x16xbf16>, vector<16x32xbf16>, vector<16x32xf32> -> vector<16x32xf32>
    %146 = arith.truncf %145 : vector<16x32xf32> to vector<16x32xbf16>
    %c3_62 = arith.constant 3 : index
    %c0_63 = arith.constant 0 : index
    %c0_64 = arith.constant 0 : index
    %147 = vector.load %arg2[%c3_62, %c0_63, %c0_64] : memref<12x32x32xbf16, #tpu.memory_space<vmem>>, vector<1x32x32xbf16>
    %148 = vector.shape_cast %147 : vector<1x32x32xbf16> to vector<32x32xbf16>
    %cst_65 = arith.constant dense<0.000000e+00> : vector<16x32xf32>
    %149 = tpu.matmul %146, %148, %cst_65 {dimension_numbers = #tpu.dot_dimension_numbers<[1], [0], [0], [1], [0, 0, 1, 1], [], []>} : vector<16x32xbf16>, vector<32x32xbf16>, vector<16x32xf32> -> vector<16x32xf32>
    %c3_66 = arith.constant 3 : index
    %c0_67 = arith.constant 0 : index
    %c0_68 = arith.constant 0 : index
    %150 = vector.load %arg3[%c3_66, %c0_67, %c0_68] : memref<12x32x32xbf16, #tpu.memory_space<vmem>>, vector<1x32x32xbf16>
    %151 = vector.shape_cast %150 : vector<1x32x32xbf16> to vector<32x32xbf16>
    %cst_69 = arith.constant dense<0.000000e+00> : vector<16x32xf32>
    %152 = tpu.matmul %144, %151, %cst_69 {dimension_numbers = #tpu.dot_dimension_numbers<[1], [0], [0], [1], [0, 0, 1, 1], [], []>} : vector<16x32xbf16>, vector<32x32xbf16>, vector<16x32xf32> -> vector<16x32xf32>
    %153 = arith.addf %149, %152 : vector<16x32xf32>
    %154 = vector.extract_strided_slice %121 {offsets = [2, 0], sizes = [1, 32], strides = [1, 1]} : vector<3x32xf32> to vector<1x32xf32>
    %155 = vector.broadcast %154 : vector<1x32xf32> to vector<16x32xf32>
    %156 = arith.addf %153, %155 : vector<16x32xf32>
    %cst_70 = arith.constant 0.000000e+00 : f32
    %157 = vector.broadcast %cst_70 : f32 to vector<16x32xf32>
    %158 = arith.maximumf %156, %157 : vector<16x32xf32>
    %c4 = arith.constant 4 : index
    %c0_71 = arith.constant 0 : index
    %c0_72 = arith.constant 0 : index
    %159 = vector.load %arg4[%c4, %c0_71, %c0_72] : memref<12x3x32xf32, #tpu.memory_space<vmem>>, vector<1x3x32xf32>
    %160 = vector.shape_cast %159 : vector<1x3x32xf32> to vector<3x32xf32>
    %cst_73 = arith.constant dense<0.000000e+00> : vector<32xf32>
    %161 = vector.multi_reduction <add>, %158, %cst_73 [0] : vector<16x32xf32> to vector<32xf32>
    %162 = vector.shape_cast %161 : vector<32xf32> to vector<1x32xf32>
    %cst_74 = arith.constant 1.600000e+01 : f32
    %163 = vector.broadcast %cst_74 : f32 to vector<1x32xf32>
    %164 = arith.divf %162, %163 : vector<1x32xf32>
    %165 = vector.broadcast %164 : vector<1x32xf32> to vector<16x32xf32>
    %166 = arith.subf %158, %165 : vector<16x32xf32>
    %167 = arith.mulf %166, %166 : vector<16x32xf32>
    %cst_75 = arith.constant dense<0.000000e+00> : vector<32xf32>
    %168 = vector.multi_reduction <add>, %167, %cst_75 [0] : vector<16x32xf32> to vector<32xf32>
    %169 = vector.shape_cast %168 : vector<32xf32> to vector<1x32xf32>
    %cst_76 = arith.constant 1.600000e+01 : f32
    %170 = vector.broadcast %cst_76 : f32 to vector<1x32xf32>
    %171 = arith.divf %169, %170 : vector<1x32xf32>
    %cst_77 = arith.constant 9.99999974E-6 : f32
    %172 = vector.broadcast %cst_77 : f32 to vector<1x32xf32>
    %173 = arith.addf %171, %172 : vector<1x32xf32>
    %174 = math.rsqrt %173 : vector<1x32xf32>
    %175 = vector.broadcast %174 : vector<1x32xf32> to vector<16x32xf32>
    %176 = arith.mulf %166, %175 : vector<16x32xf32>
    %177 = vector.extract_strided_slice %160 {offsets = [0, 0], sizes = [1, 32], strides = [1, 1]} : vector<3x32xf32> to vector<1x32xf32>
    %178 = vector.broadcast %177 : vector<1x32xf32> to vector<16x32xf32>
    %179 = arith.mulf %176, %178 : vector<16x32xf32>
    %180 = vector.extract_strided_slice %160 {offsets = [1, 0], sizes = [1, 32], strides = [1, 1]} : vector<3x32xf32> to vector<1x32xf32>
    %181 = vector.broadcast %180 : vector<1x32xf32> to vector<16x32xf32>
    %182 = arith.addf %179, %181 : vector<16x32xf32>
    %183 = arith.truncf %182 : vector<16x32xf32> to vector<16x32xbf16>
    %cst_78 = arith.constant dense<0.000000e+00> : vector<16x32xf32>
    %184 = tpu.matmul %2, %183, %cst_78 {dimension_numbers = #tpu.dot_dimension_numbers<[1], [0], [0], [1], [0, 0, 1, 1], [], []>} : vector<16x16xbf16>, vector<16x32xbf16>, vector<16x32xf32> -> vector<16x32xf32>
    %185 = arith.truncf %184 : vector<16x32xf32> to vector<16x32xbf16>
    %c4_79 = arith.constant 4 : index
    %c0_80 = arith.constant 0 : index
    %c0_81 = arith.constant 0 : index
    %186 = vector.load %arg2[%c4_79, %c0_80, %c0_81] : memref<12x32x32xbf16, #tpu.memory_space<vmem>>, vector<1x32x32xbf16>
    %187 = vector.shape_cast %186 : vector<1x32x32xbf16> to vector<32x32xbf16>
    %cst_82 = arith.constant dense<0.000000e+00> : vector<16x32xf32>
    %188 = tpu.matmul %185, %187, %cst_82 {dimension_numbers = #tpu.dot_dimension_numbers<[1], [0], [0], [1], [0, 0, 1, 1], [], []>} : vector<16x32xbf16>, vector<32x32xbf16>, vector<16x32xf32> -> vector<16x32xf32>
    %c4_83 = arith.constant 4 : index
    %c0_84 = arith.constant 0 : index
    %c0_85 = arith.constant 0 : index
    %189 = vector.load %arg3[%c4_83, %c0_84, %c0_85] : memref<12x32x32xbf16, #tpu.memory_space<vmem>>, vector<1x32x32xbf16>
    %190 = vector.shape_cast %189 : vector<1x32x32xbf16> to vector<32x32xbf16>
    %cst_86 = arith.constant dense<0.000000e+00> : vector<16x32xf32>
    %191 = tpu.matmul %183, %190, %cst_86 {dimension_numbers = #tpu.dot_dimension_numbers<[1], [0], [0], [1], [0, 0, 1, 1], [], []>} : vector<16x32xbf16>, vector<32x32xbf16>, vector<16x32xf32> -> vector<16x32xf32>
    %192 = arith.addf %188, %191 : vector<16x32xf32>
    %193 = vector.extract_strided_slice %160 {offsets = [2, 0], sizes = [1, 32], strides = [1, 1]} : vector<3x32xf32> to vector<1x32xf32>
    %194 = vector.broadcast %193 : vector<1x32xf32> to vector<16x32xf32>
    %195 = arith.addf %192, %194 : vector<16x32xf32>
    %cst_87 = arith.constant 0.000000e+00 : f32
    %196 = vector.broadcast %cst_87 : f32 to vector<16x32xf32>
    %197 = arith.maximumf %195, %196 : vector<16x32xf32>
    %c5 = arith.constant 5 : index
    %c0_88 = arith.constant 0 : index
    %c0_89 = arith.constant 0 : index
    %198 = vector.load %arg4[%c5, %c0_88, %c0_89] : memref<12x3x32xf32, #tpu.memory_space<vmem>>, vector<1x3x32xf32>
    %199 = vector.shape_cast %198 : vector<1x3x32xf32> to vector<3x32xf32>
    %cst_90 = arith.constant dense<0.000000e+00> : vector<32xf32>
    %200 = vector.multi_reduction <add>, %197, %cst_90 [0] : vector<16x32xf32> to vector<32xf32>
    %201 = vector.shape_cast %200 : vector<32xf32> to vector<1x32xf32>
    %cst_91 = arith.constant 1.600000e+01 : f32
    %202 = vector.broadcast %cst_91 : f32 to vector<1x32xf32>
    %203 = arith.divf %201, %202 : vector<1x32xf32>
    %204 = vector.broadcast %203 : vector<1x32xf32> to vector<16x32xf32>
    %205 = arith.subf %197, %204 : vector<16x32xf32>
    %206 = arith.mulf %205, %205 : vector<16x32xf32>
    %cst_92 = arith.constant dense<0.000000e+00> : vector<32xf32>
    %207 = vector.multi_reduction <add>, %206, %cst_92 [0] : vector<16x32xf32> to vector<32xf32>
    %208 = vector.shape_cast %207 : vector<32xf32> to vector<1x32xf32>
    %cst_93 = arith.constant 1.600000e+01 : f32
    %209 = vector.broadcast %cst_93 : f32 to vector<1x32xf32>
    %210 = arith.divf %208, %209 : vector<1x32xf32>
    %cst_94 = arith.constant 9.99999974E-6 : f32
    %211 = vector.broadcast %cst_94 : f32 to vector<1x32xf32>
    %212 = arith.addf %210, %211 : vector<1x32xf32>
    %213 = math.rsqrt %212 : vector<1x32xf32>
    %214 = vector.broadcast %213 : vector<1x32xf32> to vector<16x32xf32>
    %215 = arith.mulf %205, %214 : vector<16x32xf32>
    %216 = vector.extract_strided_slice %199 {offsets = [0, 0], sizes = [1, 32], strides = [1, 1]} : vector<3x32xf32> to vector<1x32xf32>
    %217 = vector.broadcast %216 : vector<1x32xf32> to vector<16x32xf32>
    %218 = arith.mulf %215, %217 : vector<16x32xf32>
    %219 = vector.extract_strided_slice %199 {offsets = [1, 0], sizes = [1, 32], strides = [1, 1]} : vector<3x32xf32> to vector<1x32xf32>
    %220 = vector.broadcast %219 : vector<1x32xf32> to vector<16x32xf32>
    %221 = arith.addf %218, %220 : vector<16x32xf32>
    %222 = arith.truncf %221 : vector<16x32xf32> to vector<16x32xbf16>
    %cst_95 = arith.constant dense<0.000000e+00> : vector<16x32xf32>
    %223 = tpu.matmul %2, %222, %cst_95 {dimension_numbers = #tpu.dot_dimension_numbers<[1], [0], [0], [1], [0, 0, 1, 1], [], []>} : vector<16x16xbf16>, vector<16x32xbf16>, vector<16x32xf32> -> vector<16x32xf32>
    %224 = arith.truncf %223 : vector<16x32xf32> to vector<16x32xbf16>
    %c5_96 = arith.constant 5 : index
    %c0_97 = arith.constant 0 : index
    %c0_98 = arith.constant 0 : index
    %225 = vector.load %arg2[%c5_96, %c0_97, %c0_98] : memref<12x32x32xbf16, #tpu.memory_space<vmem>>, vector<1x32x32xbf16>
    %226 = vector.shape_cast %225 : vector<1x32x32xbf16> to vector<32x32xbf16>
    %cst_99 = arith.constant dense<0.000000e+00> : vector<16x32xf32>
    %227 = tpu.matmul %224, %226, %cst_99 {dimension_numbers = #tpu.dot_dimension_numbers<[1], [0], [0], [1], [0, 0, 1, 1], [], []>} : vector<16x32xbf16>, vector<32x32xbf16>, vector<16x32xf32> -> vector<16x32xf32>
    %c5_100 = arith.constant 5 : index
    %c0_101 = arith.constant 0 : index
    %c0_102 = arith.constant 0 : index
    %228 = vector.load %arg3[%c5_100, %c0_101, %c0_102] : memref<12x32x32xbf16, #tpu.memory_space<vmem>>, vector<1x32x32xbf16>
    %229 = vector.shape_cast %228 : vector<1x32x32xbf16> to vector<32x32xbf16>
    %cst_103 = arith.constant dense<0.000000e+00> : vector<16x32xf32>
    %230 = tpu.matmul %222, %229, %cst_103 {dimension_numbers = #tpu.dot_dimension_numbers<[1], [0], [0], [1], [0, 0, 1, 1], [], []>} : vector<16x32xbf16>, vector<32x32xbf16>, vector<16x32xf32> -> vector<16x32xf32>
    %231 = arith.addf %227, %230 : vector<16x32xf32>
    %232 = vector.extract_strided_slice %199 {offsets = [2, 0], sizes = [1, 32], strides = [1, 1]} : vector<3x32xf32> to vector<1x32xf32>
    %233 = vector.broadcast %232 : vector<1x32xf32> to vector<16x32xf32>
    %234 = arith.addf %231, %233 : vector<16x32xf32>
    %cst_104 = arith.constant 0.000000e+00 : f32
    %235 = vector.broadcast %cst_104 : f32 to vector<16x32xf32>
    %236 = arith.maximumf %234, %235 : vector<16x32xf32>
    %c6 = arith.constant 6 : index
    %c0_105 = arith.constant 0 : index
    %c0_106 = arith.constant 0 : index
    %237 = vector.load %arg4[%c6, %c0_105, %c0_106] : memref<12x3x32xf32, #tpu.memory_space<vmem>>, vector<1x3x32xf32>
    %238 = vector.shape_cast %237 : vector<1x3x32xf32> to vector<3x32xf32>
    %cst_107 = arith.constant dense<0.000000e+00> : vector<32xf32>
    %239 = vector.multi_reduction <add>, %236, %cst_107 [0] : vector<16x32xf32> to vector<32xf32>
    %240 = vector.shape_cast %239 : vector<32xf32> to vector<1x32xf32>
    %cst_108 = arith.constant 1.600000e+01 : f32
    %241 = vector.broadcast %cst_108 : f32 to vector<1x32xf32>
    %242 = arith.divf %240, %241 : vector<1x32xf32>
    %243 = vector.broadcast %242 : vector<1x32xf32> to vector<16x32xf32>
    %244 = arith.subf %236, %243 : vector<16x32xf32>
    %245 = arith.mulf %244, %244 : vector<16x32xf32>
    %cst_109 = arith.constant dense<0.000000e+00> : vector<32xf32>
    %246 = vector.multi_reduction <add>, %245, %cst_109 [0] : vector<16x32xf32> to vector<32xf32>
    %247 = vector.shape_cast %246 : vector<32xf32> to vector<1x32xf32>
    %cst_110 = arith.constant 1.600000e+01 : f32
    %248 = vector.broadcast %cst_110 : f32 to vector<1x32xf32>
    %249 = arith.divf %247, %248 : vector<1x32xf32>
    %cst_111 = arith.constant 9.99999974E-6 : f32
    %250 = vector.broadcast %cst_111 : f32 to vector<1x32xf32>
    %251 = arith.addf %249, %250 : vector<1x32xf32>
    %252 = math.rsqrt %251 : vector<1x32xf32>
    %253 = vector.broadcast %252 : vector<1x32xf32> to vector<16x32xf32>
    %254 = arith.mulf %244, %253 : vector<16x32xf32>
    %255 = vector.extract_strided_slice %238 {offsets = [0, 0], sizes = [1, 32], strides = [1, 1]} : vector<3x32xf32> to vector<1x32xf32>
    %256 = vector.broadcast %255 : vector<1x32xf32> to vector<16x32xf32>
    %257 = arith.mulf %254, %256 : vector<16x32xf32>
    %258 = vector.extract_strided_slice %238 {offsets = [1, 0], sizes = [1, 32], strides = [1, 1]} : vector<3x32xf32> to vector<1x32xf32>
    %259 = vector.broadcast %258 : vector<1x32xf32> to vector<16x32xf32>
    %260 = arith.addf %257, %259 : vector<16x32xf32>
    %261 = arith.truncf %260 : vector<16x32xf32> to vector<16x32xbf16>
    %cst_112 = arith.constant dense<0.000000e+00> : vector<16x32xf32>
    %262 = tpu.matmul %2, %261, %cst_112 {dimension_numbers = #tpu.dot_dimension_numbers<[1], [0], [0], [1], [0, 0, 1, 1], [], []>} : vector<16x16xbf16>, vector<16x32xbf16>, vector<16x32xf32> -> vector<16x32xf32>
    %263 = arith.truncf %262 : vector<16x32xf32> to vector<16x32xbf16>
    %c6_113 = arith.constant 6 : index
    %c0_114 = arith.constant 0 : index
    %c0_115 = arith.constant 0 : index
    %264 = vector.load %arg2[%c6_113, %c0_114, %c0_115] : memref<12x32x32xbf16, #tpu.memory_space<vmem>>, vector<1x32x32xbf16>
    %265 = vector.shape_cast %264 : vector<1x32x32xbf16> to vector<32x32xbf16>
    %cst_116 = arith.constant dense<0.000000e+00> : vector<16x32xf32>
    %266 = tpu.matmul %263, %265, %cst_116 {dimension_numbers = #tpu.dot_dimension_numbers<[1], [0], [0], [1], [0, 0, 1, 1], [], []>} : vector<16x32xbf16>, vector<32x32xbf16>, vector<16x32xf32> -> vector<16x32xf32>
    %c6_117 = arith.constant 6 : index
    %c0_118 = arith.constant 0 : index
    %c0_119 = arith.constant 0 : index
    %267 = vector.load %arg3[%c6_117, %c0_118, %c0_119] : memref<12x32x32xbf16, #tpu.memory_space<vmem>>, vector<1x32x32xbf16>
    %268 = vector.shape_cast %267 : vector<1x32x32xbf16> to vector<32x32xbf16>
    %cst_120 = arith.constant dense<0.000000e+00> : vector<16x32xf32>
    %269 = tpu.matmul %261, %268, %cst_120 {dimension_numbers = #tpu.dot_dimension_numbers<[1], [0], [0], [1], [0, 0, 1, 1], [], []>} : vector<16x32xbf16>, vector<32x32xbf16>, vector<16x32xf32> -> vector<16x32xf32>
    %270 = arith.addf %266, %269 : vector<16x32xf32>
    %271 = vector.extract_strided_slice %238 {offsets = [2, 0], sizes = [1, 32], strides = [1, 1]} : vector<3x32xf32> to vector<1x32xf32>
    %272 = vector.broadcast %271 : vector<1x32xf32> to vector<16x32xf32>
    %273 = arith.addf %270, %272 : vector<16x32xf32>
    %cst_121 = arith.constant 0.000000e+00 : f32
    %274 = vector.broadcast %cst_121 : f32 to vector<16x32xf32>
    %275 = arith.maximumf %273, %274 : vector<16x32xf32>
    %c7 = arith.constant 7 : index
    %c0_122 = arith.constant 0 : index
    %c0_123 = arith.constant 0 : index
    %276 = vector.load %arg4[%c7, %c0_122, %c0_123] : memref<12x3x32xf32, #tpu.memory_space<vmem>>, vector<1x3x32xf32>
    %277 = vector.shape_cast %276 : vector<1x3x32xf32> to vector<3x32xf32>
    %cst_124 = arith.constant dense<0.000000e+00> : vector<32xf32>
    %278 = vector.multi_reduction <add>, %275, %cst_124 [0] : vector<16x32xf32> to vector<32xf32>
    %279 = vector.shape_cast %278 : vector<32xf32> to vector<1x32xf32>
    %cst_125 = arith.constant 1.600000e+01 : f32
    %280 = vector.broadcast %cst_125 : f32 to vector<1x32xf32>
    %281 = arith.divf %279, %280 : vector<1x32xf32>
    %282 = vector.broadcast %281 : vector<1x32xf32> to vector<16x32xf32>
    %283 = arith.subf %275, %282 : vector<16x32xf32>
    %284 = arith.mulf %283, %283 : vector<16x32xf32>
    %cst_126 = arith.constant dense<0.000000e+00> : vector<32xf32>
    %285 = vector.multi_reduction <add>, %284, %cst_126 [0] : vector<16x32xf32> to vector<32xf32>
    %286 = vector.shape_cast %285 : vector<32xf32> to vector<1x32xf32>
    %cst_127 = arith.constant 1.600000e+01 : f32
    %287 = vector.broadcast %cst_127 : f32 to vector<1x32xf32>
    %288 = arith.divf %286, %287 : vector<1x32xf32>
    %cst_128 = arith.constant 9.99999974E-6 : f32
    %289 = vector.broadcast %cst_128 : f32 to vector<1x32xf32>
    %290 = arith.addf %288, %289 : vector<1x32xf32>
    %291 = math.rsqrt %290 : vector<1x32xf32>
    %292 = vector.broadcast %291 : vector<1x32xf32> to vector<16x32xf32>
    %293 = arith.mulf %283, %292 : vector<16x32xf32>
    %294 = vector.extract_strided_slice %277 {offsets = [0, 0], sizes = [1, 32], strides = [1, 1]} : vector<3x32xf32> to vector<1x32xf32>
    %295 = vector.broadcast %294 : vector<1x32xf32> to vector<16x32xf32>
    %296 = arith.mulf %293, %295 : vector<16x32xf32>
    %297 = vector.extract_strided_slice %277 {offsets = [1, 0], sizes = [1, 32], strides = [1, 1]} : vector<3x32xf32> to vector<1x32xf32>
    %298 = vector.broadcast %297 : vector<1x32xf32> to vector<16x32xf32>
    %299 = arith.addf %296, %298 : vector<16x32xf32>
    %300 = arith.truncf %299 : vector<16x32xf32> to vector<16x32xbf16>
    %cst_129 = arith.constant dense<0.000000e+00> : vector<16x32xf32>
    %301 = tpu.matmul %2, %300, %cst_129 {dimension_numbers = #tpu.dot_dimension_numbers<[1], [0], [0], [1], [0, 0, 1, 1], [], []>} : vector<16x16xbf16>, vector<16x32xbf16>, vector<16x32xf32> -> vector<16x32xf32>
    %302 = arith.truncf %301 : vector<16x32xf32> to vector<16x32xbf16>
    %c7_130 = arith.constant 7 : index
    %c0_131 = arith.constant 0 : index
    %c0_132 = arith.constant 0 : index
    %303 = vector.load %arg2[%c7_130, %c0_131, %c0_132] : memref<12x32x32xbf16, #tpu.memory_space<vmem>>, vector<1x32x32xbf16>
    %304 = vector.shape_cast %303 : vector<1x32x32xbf16> to vector<32x32xbf16>
    %cst_133 = arith.constant dense<0.000000e+00> : vector<16x32xf32>
    %305 = tpu.matmul %302, %304, %cst_133 {dimension_numbers = #tpu.dot_dimension_numbers<[1], [0], [0], [1], [0, 0, 1, 1], [], []>} : vector<16x32xbf16>, vector<32x32xbf16>, vector<16x32xf32> -> vector<16x32xf32>
    %c7_134 = arith.constant 7 : index
    %c0_135 = arith.constant 0 : index
    %c0_136 = arith.constant 0 : index
    %306 = vector.load %arg3[%c7_134, %c0_135, %c0_136] : memref<12x32x32xbf16, #tpu.memory_space<vmem>>, vector<1x32x32xbf16>
    %307 = vector.shape_cast %306 : vector<1x32x32xbf16> to vector<32x32xbf16>
    %cst_137 = arith.constant dense<0.000000e+00> : vector<16x32xf32>
    %308 = tpu.matmul %300, %307, %cst_137 {dimension_numbers = #tpu.dot_dimension_numbers<[1], [0], [0], [1], [0, 0, 1, 1], [], []>} : vector<16x32xbf16>, vector<32x32xbf16>, vector<16x32xf32> -> vector<16x32xf32>
    %309 = arith.addf %305, %308 : vector<16x32xf32>
    %310 = vector.extract_strided_slice %277 {offsets = [2, 0], sizes = [1, 32], strides = [1, 1]} : vector<3x32xf32> to vector<1x32xf32>
    %311 = vector.broadcast %310 : vector<1x32xf32> to vector<16x32xf32>
    %312 = arith.addf %309, %311 : vector<16x32xf32>
    %cst_138 = arith.constant 0.000000e+00 : f32
    %313 = vector.broadcast %cst_138 : f32 to vector<16x32xf32>
    %314 = arith.maximumf %312, %313 : vector<16x32xf32>
    %c8 = arith.constant 8 : index
    %c0_139 = arith.constant 0 : index
    %c0_140 = arith.constant 0 : index
    %315 = vector.load %arg4[%c8, %c0_139, %c0_140] : memref<12x3x32xf32, #tpu.memory_space<vmem>>, vector<1x3x32xf32>
    %316 = vector.shape_cast %315 : vector<1x3x32xf32> to vector<3x32xf32>
    %cst_141 = arith.constant dense<0.000000e+00> : vector<32xf32>
    %317 = vector.multi_reduction <add>, %314, %cst_141 [0] : vector<16x32xf32> to vector<32xf32>
    %318 = vector.shape_cast %317 : vector<32xf32> to vector<1x32xf32>
    %cst_142 = arith.constant 1.600000e+01 : f32
    %319 = vector.broadcast %cst_142 : f32 to vector<1x32xf32>
    %320 = arith.divf %318, %319 : vector<1x32xf32>
    %321 = vector.broadcast %320 : vector<1x32xf32> to vector<16x32xf32>
    %322 = arith.subf %314, %321 : vector<16x32xf32>
    %323 = arith.mulf %322, %322 : vector<16x32xf32>
    %cst_143 = arith.constant dense<0.000000e+00> : vector<32xf32>
    %324 = vector.multi_reduction <add>, %323, %cst_143 [0] : vector<16x32xf32> to vector<32xf32>
    %325 = vector.shape_cast %324 : vector<32xf32> to vector<1x32xf32>
    %cst_144 = arith.constant 1.600000e+01 : f32
    %326 = vector.broadcast %cst_144 : f32 to vector<1x32xf32>
    %327 = arith.divf %325, %326 : vector<1x32xf32>
    %cst_145 = arith.constant 9.99999974E-6 : f32
    %328 = vector.broadcast %cst_145 : f32 to vector<1x32xf32>
    %329 = arith.addf %327, %328 : vector<1x32xf32>
    %330 = math.rsqrt %329 : vector<1x32xf32>
    %331 = vector.broadcast %330 : vector<1x32xf32> to vector<16x32xf32>
    %332 = arith.mulf %322, %331 : vector<16x32xf32>
    %333 = vector.extract_strided_slice %316 {offsets = [0, 0], sizes = [1, 32], strides = [1, 1]} : vector<3x32xf32> to vector<1x32xf32>
    %334 = vector.broadcast %333 : vector<1x32xf32> to vector<16x32xf32>
    %335 = arith.mulf %332, %334 : vector<16x32xf32>
    %336 = vector.extract_strided_slice %316 {offsets = [1, 0], sizes = [1, 32], strides = [1, 1]} : vector<3x32xf32> to vector<1x32xf32>
    %337 = vector.broadcast %336 : vector<1x32xf32> to vector<16x32xf32>
    %338 = arith.addf %335, %337 : vector<16x32xf32>
    %339 = arith.truncf %338 : vector<16x32xf32> to vector<16x32xbf16>
    %cst_146 = arith.constant dense<0.000000e+00> : vector<16x32xf32>
    %340 = tpu.matmul %2, %339, %cst_146 {dimension_numbers = #tpu.dot_dimension_numbers<[1], [0], [0], [1], [0, 0, 1, 1], [], []>} : vector<16x16xbf16>, vector<16x32xbf16>, vector<16x32xf32> -> vector<16x32xf32>
    %341 = arith.truncf %340 : vector<16x32xf32> to vector<16x32xbf16>
    %c8_147 = arith.constant 8 : index
    %c0_148 = arith.constant 0 : index
    %c0_149 = arith.constant 0 : index
    %342 = vector.load %arg2[%c8_147, %c0_148, %c0_149] : memref<12x32x32xbf16, #tpu.memory_space<vmem>>, vector<1x32x32xbf16>
    %343 = vector.shape_cast %342 : vector<1x32x32xbf16> to vector<32x32xbf16>
    %cst_150 = arith.constant dense<0.000000e+00> : vector<16x32xf32>
    %344 = tpu.matmul %341, %343, %cst_150 {dimension_numbers = #tpu.dot_dimension_numbers<[1], [0], [0], [1], [0, 0, 1, 1], [], []>} : vector<16x32xbf16>, vector<32x32xbf16>, vector<16x32xf32> -> vector<16x32xf32>
    %c8_151 = arith.constant 8 : index
    %c0_152 = arith.constant 0 : index
    %c0_153 = arith.constant 0 : index
    %345 = vector.load %arg3[%c8_151, %c0_152, %c0_153] : memref<12x32x32xbf16, #tpu.memory_space<vmem>>, vector<1x32x32xbf16>
    %346 = vector.shape_cast %345 : vector<1x32x32xbf16> to vector<32x32xbf16>
    %cst_154 = arith.constant dense<0.000000e+00> : vector<16x32xf32>
    %347 = tpu.matmul %339, %346, %cst_154 {dimension_numbers = #tpu.dot_dimension_numbers<[1], [0], [0], [1], [0, 0, 1, 1], [], []>} : vector<16x32xbf16>, vector<32x32xbf16>, vector<16x32xf32> -> vector<16x32xf32>
    %348 = arith.addf %344, %347 : vector<16x32xf32>
    %349 = vector.extract_strided_slice %316 {offsets = [2, 0], sizes = [1, 32], strides = [1, 1]} : vector<3x32xf32> to vector<1x32xf32>
    %350 = vector.broadcast %349 : vector<1x32xf32> to vector<16x32xf32>
    %351 = arith.addf %348, %350 : vector<16x32xf32>
    %cst_155 = arith.constant 0.000000e+00 : f32
    %352 = vector.broadcast %cst_155 : f32 to vector<16x32xf32>
    %353 = arith.maximumf %351, %352 : vector<16x32xf32>
    %c9 = arith.constant 9 : index
    %c0_156 = arith.constant 0 : index
    %c0_157 = arith.constant 0 : index
    %354 = vector.load %arg4[%c9, %c0_156, %c0_157] : memref<12x3x32xf32, #tpu.memory_space<vmem>>, vector<1x3x32xf32>
    %355 = vector.shape_cast %354 : vector<1x3x32xf32> to vector<3x32xf32>
    %cst_158 = arith.constant dense<0.000000e+00> : vector<32xf32>
    %356 = vector.multi_reduction <add>, %353, %cst_158 [0] : vector<16x32xf32> to vector<32xf32>
    %357 = vector.shape_cast %356 : vector<32xf32> to vector<1x32xf32>
    %cst_159 = arith.constant 1.600000e+01 : f32
    %358 = vector.broadcast %cst_159 : f32 to vector<1x32xf32>
    %359 = arith.divf %357, %358 : vector<1x32xf32>
    %360 = vector.broadcast %359 : vector<1x32xf32> to vector<16x32xf32>
    %361 = arith.subf %353, %360 : vector<16x32xf32>
    %362 = arith.mulf %361, %361 : vector<16x32xf32>
    %cst_160 = arith.constant dense<0.000000e+00> : vector<32xf32>
    %363 = vector.multi_reduction <add>, %362, %cst_160 [0] : vector<16x32xf32> to vector<32xf32>
    %364 = vector.shape_cast %363 : vector<32xf32> to vector<1x32xf32>
    %cst_161 = arith.constant 1.600000e+01 : f32
    %365 = vector.broadcast %cst_161 : f32 to vector<1x32xf32>
    %366 = arith.divf %364, %365 : vector<1x32xf32>
    %cst_162 = arith.constant 9.99999974E-6 : f32
    %367 = vector.broadcast %cst_162 : f32 to vector<1x32xf32>
    %368 = arith.addf %366, %367 : vector<1x32xf32>
    %369 = math.rsqrt %368 : vector<1x32xf32>
    %370 = vector.broadcast %369 : vector<1x32xf32> to vector<16x32xf32>
    %371 = arith.mulf %361, %370 : vector<16x32xf32>
    %372 = vector.extract_strided_slice %355 {offsets = [0, 0], sizes = [1, 32], strides = [1, 1]} : vector<3x32xf32> to vector<1x32xf32>
    %373 = vector.broadcast %372 : vector<1x32xf32> to vector<16x32xf32>
    %374 = arith.mulf %371, %373 : vector<16x32xf32>
    %375 = vector.extract_strided_slice %355 {offsets = [1, 0], sizes = [1, 32], strides = [1, 1]} : vector<3x32xf32> to vector<1x32xf32>
    %376 = vector.broadcast %375 : vector<1x32xf32> to vector<16x32xf32>
    %377 = arith.addf %374, %376 : vector<16x32xf32>
    %378 = arith.truncf %377 : vector<16x32xf32> to vector<16x32xbf16>
    %cst_163 = arith.constant dense<0.000000e+00> : vector<16x32xf32>
    %379 = tpu.matmul %2, %378, %cst_163 {dimension_numbers = #tpu.dot_dimension_numbers<[1], [0], [0], [1], [0, 0, 1, 1], [], []>} : vector<16x16xbf16>, vector<16x32xbf16>, vector<16x32xf32> -> vector<16x32xf32>
    %380 = arith.truncf %379 : vector<16x32xf32> to vector<16x32xbf16>
    %c9_164 = arith.constant 9 : index
    %c0_165 = arith.constant 0 : index
    %c0_166 = arith.constant 0 : index
    %381 = vector.load %arg2[%c9_164, %c0_165, %c0_166] : memref<12x32x32xbf16, #tpu.memory_space<vmem>>, vector<1x32x32xbf16>
    %382 = vector.shape_cast %381 : vector<1x32x32xbf16> to vector<32x32xbf16>
    %cst_167 = arith.constant dense<0.000000e+00> : vector<16x32xf32>
    %383 = tpu.matmul %380, %382, %cst_167 {dimension_numbers = #tpu.dot_dimension_numbers<[1], [0], [0], [1], [0, 0, 1, 1], [], []>} : vector<16x32xbf16>, vector<32x32xbf16>, vector<16x32xf32> -> vector<16x32xf32>
    %c9_168 = arith.constant 9 : index
    %c0_169 = arith.constant 0 : index
    %c0_170 = arith.constant 0 : index
    %384 = vector.load %arg3[%c9_168, %c0_169, %c0_170] : memref<12x32x32xbf16, #tpu.memory_space<vmem>>, vector<1x32x32xbf16>
    %385 = vector.shape_cast %384 : vector<1x32x32xbf16> to vector<32x32xbf16>
    %cst_171 = arith.constant dense<0.000000e+00> : vector<16x32xf32>
    %386 = tpu.matmul %378, %385, %cst_171 {dimension_numbers = #tpu.dot_dimension_numbers<[1], [0], [0], [1], [0, 0, 1, 1], [], []>} : vector<16x32xbf16>, vector<32x32xbf16>, vector<16x32xf32> -> vector<16x32xf32>
    %387 = arith.addf %383, %386 : vector<16x32xf32>
    %388 = vector.extract_strided_slice %355 {offsets = [2, 0], sizes = [1, 32], strides = [1, 1]} : vector<3x32xf32> to vector<1x32xf32>
    %389 = vector.broadcast %388 : vector<1x32xf32> to vector<16x32xf32>
    %390 = arith.addf %387, %389 : vector<16x32xf32>
    %cst_172 = arith.constant 0.000000e+00 : f32
    %391 = vector.broadcast %cst_172 : f32 to vector<16x32xf32>
    %392 = arith.maximumf %390, %391 : vector<16x32xf32>
    %c10 = arith.constant 10 : index
    %c0_173 = arith.constant 0 : index
    %c0_174 = arith.constant 0 : index
    %393 = vector.load %arg4[%c10, %c0_173, %c0_174] : memref<12x3x32xf32, #tpu.memory_space<vmem>>, vector<1x3x32xf32>
    %394 = vector.shape_cast %393 : vector<1x3x32xf32> to vector<3x32xf32>
    %cst_175 = arith.constant dense<0.000000e+00> : vector<32xf32>
    %395 = vector.multi_reduction <add>, %392, %cst_175 [0] : vector<16x32xf32> to vector<32xf32>
    %396 = vector.shape_cast %395 : vector<32xf32> to vector<1x32xf32>
    %cst_176 = arith.constant 1.600000e+01 : f32
    %397 = vector.broadcast %cst_176 : f32 to vector<1x32xf32>
    %398 = arith.divf %396, %397 : vector<1x32xf32>
    %399 = vector.broadcast %398 : vector<1x32xf32> to vector<16x32xf32>
    %400 = arith.subf %392, %399 : vector<16x32xf32>
    %401 = arith.mulf %400, %400 : vector<16x32xf32>
    %cst_177 = arith.constant dense<0.000000e+00> : vector<32xf32>
    %402 = vector.multi_reduction <add>, %401, %cst_177 [0] : vector<16x32xf32> to vector<32xf32>
    %403 = vector.shape_cast %402 : vector<32xf32> to vector<1x32xf32>
    %cst_178 = arith.constant 1.600000e+01 : f32
    %404 = vector.broadcast %cst_178 : f32 to vector<1x32xf32>
    %405 = arith.divf %403, %404 : vector<1x32xf32>
    %cst_179 = arith.constant 9.99999974E-6 : f32
    %406 = vector.broadcast %cst_179 : f32 to vector<1x32xf32>
    %407 = arith.addf %405, %406 : vector<1x32xf32>
    %408 = math.rsqrt %407 : vector<1x32xf32>
    %409 = vector.broadcast %408 : vector<1x32xf32> to vector<16x32xf32>
    %410 = arith.mulf %400, %409 : vector<16x32xf32>
    %411 = vector.extract_strided_slice %394 {offsets = [0, 0], sizes = [1, 32], strides = [1, 1]} : vector<3x32xf32> to vector<1x32xf32>
    %412 = vector.broadcast %411 : vector<1x32xf32> to vector<16x32xf32>
    %413 = arith.mulf %410, %412 : vector<16x32xf32>
    %414 = vector.extract_strided_slice %394 {offsets = [1, 0], sizes = [1, 32], strides = [1, 1]} : vector<3x32xf32> to vector<1x32xf32>
    %415 = vector.broadcast %414 : vector<1x32xf32> to vector<16x32xf32>
    %416 = arith.addf %413, %415 : vector<16x32xf32>
    %417 = arith.truncf %416 : vector<16x32xf32> to vector<16x32xbf16>
    %cst_180 = arith.constant dense<0.000000e+00> : vector<16x32xf32>
    %418 = tpu.matmul %2, %417, %cst_180 {dimension_numbers = #tpu.dot_dimension_numbers<[1], [0], [0], [1], [0, 0, 1, 1], [], []>} : vector<16x16xbf16>, vector<16x32xbf16>, vector<16x32xf32> -> vector<16x32xf32>
    %419 = arith.truncf %418 : vector<16x32xf32> to vector<16x32xbf16>
    %c10_181 = arith.constant 10 : index
    %c0_182 = arith.constant 0 : index
    %c0_183 = arith.constant 0 : index
    %420 = vector.load %arg2[%c10_181, %c0_182, %c0_183] : memref<12x32x32xbf16, #tpu.memory_space<vmem>>, vector<1x32x32xbf16>
    %421 = vector.shape_cast %420 : vector<1x32x32xbf16> to vector<32x32xbf16>
    %cst_184 = arith.constant dense<0.000000e+00> : vector<16x32xf32>
    %422 = tpu.matmul %419, %421, %cst_184 {dimension_numbers = #tpu.dot_dimension_numbers<[1], [0], [0], [1], [0, 0, 1, 1], [], []>} : vector<16x32xbf16>, vector<32x32xbf16>, vector<16x32xf32> -> vector<16x32xf32>
    %c10_185 = arith.constant 10 : index
    %c0_186 = arith.constant 0 : index
    %c0_187 = arith.constant 0 : index
    %423 = vector.load %arg3[%c10_185, %c0_186, %c0_187] : memref<12x32x32xbf16, #tpu.memory_space<vmem>>, vector<1x32x32xbf16>
    %424 = vector.shape_cast %423 : vector<1x32x32xbf16> to vector<32x32xbf16>
    %cst_188 = arith.constant dense<0.000000e+00> : vector<16x32xf32>
    %425 = tpu.matmul %417, %424, %cst_188 {dimension_numbers = #tpu.dot_dimension_numbers<[1], [0], [0], [1], [0, 0, 1, 1], [], []>} : vector<16x32xbf16>, vector<32x32xbf16>, vector<16x32xf32> -> vector<16x32xf32>
    %426 = arith.addf %422, %425 : vector<16x32xf32>
    %427 = vector.extract_strided_slice %394 {offsets = [2, 0], sizes = [1, 32], strides = [1, 1]} : vector<3x32xf32> to vector<1x32xf32>
    %428 = vector.broadcast %427 : vector<1x32xf32> to vector<16x32xf32>
    %429 = arith.addf %426, %428 : vector<16x32xf32>
    %cst_189 = arith.constant 0.000000e+00 : f32
    %430 = vector.broadcast %cst_189 : f32 to vector<16x32xf32>
    %431 = arith.maximumf %429, %430 : vector<16x32xf32>
    %c11 = arith.constant 11 : index
    %c0_190 = arith.constant 0 : index
    %c0_191 = arith.constant 0 : index
    %432 = vector.load %arg4[%c11, %c0_190, %c0_191] : memref<12x3x32xf32, #tpu.memory_space<vmem>>, vector<1x3x32xf32>
    %433 = vector.shape_cast %432 : vector<1x3x32xf32> to vector<3x32xf32>
    %cst_192 = arith.constant dense<0.000000e+00> : vector<32xf32>
    %434 = vector.multi_reduction <add>, %431, %cst_192 [0] : vector<16x32xf32> to vector<32xf32>
    %435 = vector.shape_cast %434 : vector<32xf32> to vector<1x32xf32>
    %cst_193 = arith.constant 1.600000e+01 : f32
    %436 = vector.broadcast %cst_193 : f32 to vector<1x32xf32>
    %437 = arith.divf %435, %436 : vector<1x32xf32>
    %438 = vector.broadcast %437 : vector<1x32xf32> to vector<16x32xf32>
    %439 = arith.subf %431, %438 : vector<16x32xf32>
    %440 = arith.mulf %439, %439 : vector<16x32xf32>
    %cst_194 = arith.constant dense<0.000000e+00> : vector<32xf32>
    %441 = vector.multi_reduction <add>, %440, %cst_194 [0] : vector<16x32xf32> to vector<32xf32>
    %442 = vector.shape_cast %441 : vector<32xf32> to vector<1x32xf32>
    %cst_195 = arith.constant 1.600000e+01 : f32
    %443 = vector.broadcast %cst_195 : f32 to vector<1x32xf32>
    %444 = arith.divf %442, %443 : vector<1x32xf32>
    %cst_196 = arith.constant 9.99999974E-6 : f32
    %445 = vector.broadcast %cst_196 : f32 to vector<1x32xf32>
    %446 = arith.addf %444, %445 : vector<1x32xf32>
    %447 = math.rsqrt %446 : vector<1x32xf32>
    %448 = vector.broadcast %447 : vector<1x32xf32> to vector<16x32xf32>
    %449 = arith.mulf %439, %448 : vector<16x32xf32>
    %450 = vector.extract_strided_slice %433 {offsets = [0, 0], sizes = [1, 32], strides = [1, 1]} : vector<3x32xf32> to vector<1x32xf32>
    %451 = vector.broadcast %450 : vector<1x32xf32> to vector<16x32xf32>
    %452 = arith.mulf %449, %451 : vector<16x32xf32>
    %453 = vector.extract_strided_slice %433 {offsets = [1, 0], sizes = [1, 32], strides = [1, 1]} : vector<3x32xf32> to vector<1x32xf32>
    %454 = vector.broadcast %453 : vector<1x32xf32> to vector<16x32xf32>
    %455 = arith.addf %452, %454 : vector<16x32xf32>
    %456 = arith.truncf %455 : vector<16x32xf32> to vector<16x32xbf16>
    %cst_197 = arith.constant dense<0.000000e+00> : vector<16x32xf32>
    %457 = tpu.matmul %2, %456, %cst_197 {dimension_numbers = #tpu.dot_dimension_numbers<[1], [0], [0], [1], [0, 0, 1, 1], [], []>} : vector<16x16xbf16>, vector<16x32xbf16>, vector<16x32xf32> -> vector<16x32xf32>
    %458 = arith.truncf %457 : vector<16x32xf32> to vector<16x32xbf16>
    %c11_198 = arith.constant 11 : index
    %c0_199 = arith.constant 0 : index
    %c0_200 = arith.constant 0 : index
    %459 = vector.load %arg2[%c11_198, %c0_199, %c0_200] : memref<12x32x32xbf16, #tpu.memory_space<vmem>>, vector<1x32x32xbf16>
    %460 = vector.shape_cast %459 : vector<1x32x32xbf16> to vector<32x32xbf16>
    %cst_201 = arith.constant dense<0.000000e+00> : vector<16x32xf32>
    %461 = tpu.matmul %458, %460, %cst_201 {dimension_numbers = #tpu.dot_dimension_numbers<[1], [0], [0], [1], [0, 0, 1, 1], [], []>} : vector<16x32xbf16>, vector<32x32xbf16>, vector<16x32xf32> -> vector<16x32xf32>
    %c11_202 = arith.constant 11 : index
    %c0_203 = arith.constant 0 : index
    %c0_204 = arith.constant 0 : index
    %462 = vector.load %arg3[%c11_202, %c0_203, %c0_204] : memref<12x32x32xbf16, #tpu.memory_space<vmem>>, vector<1x32x32xbf16>
    %463 = vector.shape_cast %462 : vector<1x32x32xbf16> to vector<32x32xbf16>
    %cst_205 = arith.constant dense<0.000000e+00> : vector<16x32xf32>
    %464 = tpu.matmul %456, %463, %cst_205 {dimension_numbers = #tpu.dot_dimension_numbers<[1], [0], [0], [1], [0, 0, 1, 1], [], []>} : vector<16x32xbf16>, vector<32x32xbf16>, vector<16x32xf32> -> vector<16x32xf32>
    %465 = arith.addf %461, %464 : vector<16x32xf32>
    %466 = vector.extract_strided_slice %433 {offsets = [2, 0], sizes = [1, 32], strides = [1, 1]} : vector<3x32xf32> to vector<1x32xf32>
    %467 = vector.broadcast %466 : vector<1x32xf32> to vector<16x32xf32>
    %468 = arith.addf %465, %467 : vector<16x32xf32>
    %c0_206 = arith.constant 0 : index
    %c0_207 = arith.constant 0 : index
    %469 = vector.load %arg5[%c0_206, %c0_207] : memref<2x16xf32, #tpu.memory_space<vmem>>, vector<2x16xf32>
    %cst_208 = arith.constant dense<0.000000e+00> : vector<2x32xf32>
    %470 = tpu.matmul %469, %468, %cst_208 {dimension_numbers = #tpu.dot_dimension_numbers<[1], [0], [0], [1], [0, 0, 1, 1], [], []>} : vector<2x16xf32>, vector<16x32xf32>, vector<2x32xf32> -> vector<2x32xf32>
    %c0_209 = arith.constant 0 : index
    %c0_210 = arith.constant 0 : index
    %471 = vector.load %arg6[%c0_209, %c0_210] : memref<2x32xf32, #tpu.memory_space<vmem>>, vector<2x32xf32>
    tpu.vector_store %arg6[%c0_209, %c0_210], %470 {strides = array<i32>} : memref<2x32xf32, #tpu.memory_space<vmem>>, vector<2x32xf32>,
    return
  }
}

</mosaic_0001>

<bundles_post_ra>
// kernel: tpu_custom_call.1
= control target key start
LH: loop header
LB: loop body
LE: loop exit
PB: predicated region body
PF: predicated region fallthrough
CT: control target
= control target key end

     0   :  { %11 = vsyncpa [#allocation3], 0  ;;  %s2426_s0 = inlined_call_operand.hbm [shape: f32[16,32], index: 0, kind: input, shape index: {}]   ;;  %s2427_s1 = inlined_call_operand.hbm [shape: f32[16,16], index: 1, kind: input, shape index: {}]   ;;  %s2428_s2 = inlined_call_operand.hbm [shape: bf16[12,32,32], index: 2, kind: input, shape index: {}]   ;;  %s2429_s3 = inlined_call_operand.hbm [shape: bf16[12,32,32], index: 3, kind: input, shape index: {}]   ;;  %s2430_s4 = inlined_call_operand.hbm [shape: f32[12,3,32], index: 4, kind: input, shape index: {}]   ;;  %s2431_s5 = inlined_call_operand.vmem [shape: f32[2,16], index: 5, kind: input, shape index: {}]   ;;  %s2432_s6 = inlined_call_operand.hbm [shape: f32[2,32], index: 6, kind: output, shape index: {}]  }
   0x1   :  { %12 = vsyncpa [#allocation6], 0 }
   0x2   :  { %13 = vsyncpa [#allocation9], 0 }
   0x3   :  { %14 = vsyncpa [#allocation4], 0  ;;  %s32_s23 = sshll.u32 %s2427_s1, 4  ;;  %s2234_s24 = smov [#allocation5]   ;;  %s33_s23 = int_to_ptr.hbm [resolvable:$true] %s32_s23 }
   0x4   :  { %s34_s25 = sshll.u32 %s2234_s24, 4  ;;  %s2235_s26 = smov 128   ;;  %s35_s25 = int_to_ptr.vmem [resolvable:$true] %s34_s25 }
   0x5   :  { %s2236_s27 = smov 8   ;;  %s58_s30 = sshll.u32 %s2429_s3, 4  ;;  %s59_s30 = int_to_ptr.hbm [resolvable:$true] %s58_s30 }
   0x6   :  { %40 = dma.hbm_to_vmem [thread:$0]  %s33_s23, 256, %s35_s25, [#allocation6], %s2235_s26, %s2235_s26, %s2236_s27  }
   0x7   :  { %s2237_s7 = smov [#allocation8]   ;;  %s19_s11 = sshll.u32 %s2426_s0, 4  ;;  %s20_s11 = int_to_ptr.hbm [resolvable:$true] %s19_s11 }
   0x8   :  { %s60_s8 = sshll.u32 %s2237_s7, 4  ;;  %s2238_s1 = smov 64   ;;  %s61_s8 = int_to_ptr.vmem [resolvable:$true] %s60_s8 }
   0x9   :  { %s2239_s12 = smov 4   ;;  %s45_s15 = sshll.u32 %s2428_s2, 4  ;;  %s46_s15 = int_to_ptr.hbm [resolvable:$true] %s45_s15 }
   0xa   :  { %66 = dma.hbm_to_vmem [thread:$0]  %s59_s30, 3072, %s61_s8, [#allocation9], %s2238_s1, %s2238_s1, %s2239_s12  }
   0xb   :  { %s2240_s16 = smov [#allocation2]   ;;  %s2241_s3 = smov [#allocation7]  }
   0xc   :  { %s21_s17 = sshll.u32 %s2240_s16, 4  ;;  %s47_s18 = sshll.u32 %s2241_s3, 4  ;;  %s22_s17 = int_to_ptr.vmem [resolvable:$true] %s21_s17  ;;  %s48_s18 = int_to_ptr.vmem [resolvable:$true] %s47_s18 }
   0xd   :  { %27 = dma.hbm_to_vmem [thread:$0]  %s20_s11, 256, %s22_s17, [#allocation3], %s2235_s26, %s2235_s26, %s2236_s27  }
   0xe   :  { %s71_s0 = sshll.u32 %s2430_s4, 4  ;;  %s2242_s21 = smov [#allocation10]   ;;  %s72_s0 = int_to_ptr.hbm [resolvable:$true] %s71_s0 }
   0xf   :  { %53 = dma.hbm_to_vmem [thread:$0]  %s46_s15, 3072, %s48_s18, [#allocation6], %s2238_s1, %s2238_s1, %s2239_s12  }
  0x10   :  { %s73_s22 = sshll.u32 %s2242_s21, 4  ;;  %s74_s22 = int_to_ptr.vmem [resolvable:$true] %s73_s22 }
  0x11   :  { %79 = dma.hbm_to_vmem [thread:$0]  %s72_s0, 768, %s74_s22, [#allocation9], %s2238_s1, %s2238_s1, %s2239_s12  }
  0x12   :  { %2226 = dma.done.wait [#allocation3], 256  }
  0x13   :  { %2227 = vsyncadd [#allocation3], 4294967040 }
  0x14   :  { %2228 = dma.done.wait [#allocation6], 3328  }
  0x15   :  { %2229 = vsyncadd [#allocation6], 4294963968 }
  0x16   :  { %2230 = dma.done.wait [#allocation9], 3840  }
  0x17   :  { %2231 = vsyncadd [#allocation9], 4294963456  ;;  %v2243_v0 = vmov 16.0   ;;  %vm109_vm0 = vcmask 261120   ;;  %v103_v2 = vld [vmem:[#allocation2] sm:$0xff]  ;;  %v104_v3 = vld [vmem:[#allocation2 + $0x8] sm:$0xff] }
  0x18   :  { %2056 = vrcp.f32 %v2243_v0  ;;  %v110_v4 = vsel %vm109_vm0, %v103_v2, 0.0  ;;  %v111_v5 = vsel %vm109_vm0, %v104_v3, 0.0  ;;  %v108_v38 = vld [vmem:[#allocation10] sm:$0x7]  ;;  %v105_v50 = vld [vmem:[#allocation5] sm:$0xff]  ;;  %v106_v51 = vld [vmem:[#allocation5 + $0x8] sm:$0xff] }
  0x19   :  { %v112_v7 = vadd.f32 %v111_v5, %v110_v4  ;;  %v154_v41 = vperm.slane %v108_v38, 0  ;;  %v157_v45 = vperm.slane %v108_v38, 1  ;;  %v2303_v53 = vpack.c.bf16 %v106_v51, %v105_v50  ;;  %v2000_v54 = vld [vmem:[#allocation8 + $0x8] sm:$0xff]  ;;  %v1999_v56 = vld [vmem:[#allocation8] sm:$0xff]  ;;  %s2244_s23 = smov [#allocation11]   ;;  %s1756_s27 = sshll.u32 %s2432_s6, 4  ;;  %s1757_s27 = int_to_ptr.hbm [resolvable:$true] %s1756_s27 }
  0x1a   :  { %vm161_vm5 = vcmask 130048   ;;  %v1998_v55 = vld [vmem:[#allocation7 + $0x8] sm:$0xff]  ;;  %209 = vmatpush.bf16.msra.mxu1 %v2000_v54  ;;  %v1997_v57 = vld [vmem:[#allocation7] sm:$0xff]  ;;  %v246_v0 = vperm.slane %v108_v38, 2  ;;  %v2002_v54 = vld [vmem:[#allocation7 + $0x18] sm:$0xff]  ;;  %s1754_s24 = sshll.u32 %s2244_s23, 4  ;;  %s1755_s24 = int_to_ptr.vmem [resolvable:$true] %s1754_s24 }
  0x1b   :  { %v113_v9 = vrot.slane %v112_v7, 4  ;;  %238 = vmatpush.bf16.msra.mxu2 %v1998_v55  ;;  %v2001_v55 = vld [vmem:[#allocation7 + $0x10] sm:$0xff] }
  0x1d   :  { %v114_v11 = vadd.f32 %v113_v9, %v112_v7 }
  0x1e   :  { %v2057_v1 = vpop.eup %2056  ;;  %210 = vmatpush.bf16.msra.mxu1 %v1999_v56 }
  0x1f   :  { %v120_v6 = vmul.f32 16.0, %v2057_v1  ;;  %v115_v12 = vrot.slane %v114_v11, 2  ;;  %vm124_vm1 = vweird.f32 %v2057_v1  ;;  %239 = vmatpush.bf16.msra.mxu2 %v1997_v57 }
  0x21   :  { %v121_v8 = vsub.f32 1.0, %v120_v6  ;;  %v116_v14 = vadd.f32 %v115_v12, %v114_v11 }
  0x23   :  { %v122_v10 = vmul.f32 %v2057_v1, %v121_v8  ;;  %v117_v15 = vrot.slane %v116_v14, 1 }
  0x25   :  { %v123_v13 = vadd.f32 %v2057_v1, %v122_v10  ;;  %v118_v17 = vadd.f32 %v117_v15, %v116_v14 }
  0x27   :  { %v2297_v16 = vsel %vm124_vm1, %v2057_v1, %v123_v13 }
  0x28   :  { %v126_v18 = vmul.f32 %v2297_v16, %v118_v17 }
  0x2a   :  { %v127_v19 = vsub.f32 %v103_v2, %v126_v18  ;;  %v128_v20 = vsub.f32 %v104_v3, %v126_v18 }
  0x2c   :  { %v129_v21 = vmul.f32 %v127_v19, %v127_v19  ;;  %v130_v22 = vmul.f32 %v128_v20, %v128_v20 }
  0x2e   :  { %v131_v23 = vsel %vm109_vm0, %v129_v21, 0.0  ;;  %v132_v24 = vsel %vm109_vm0, %v130_v22, 0.0 }
  0x2f   :  { %v133_v25 = vadd.f32 %v132_v24, %v131_v23 }
  0x31   :  { %v134_v26 = vrot.slane %v133_v25, 4 }
  0x33   :  { %v135_v27 = vadd.f32 %v134_v26, %v133_v25 }
  0x35   :  { %v136_v28 = vrot.slane %v135_v27, 2 }
  0x37   :  { %v137_v29 = vadd.f32 %v136_v28, %v135_v27  ;;  %v2004_v27 = vld [vmem:[#allocation8 + $0x18] sm:$0xff] }
  0x39   :  { %v138_v30 = vrot.slane %v137_v29, 1 }
  0x3b   :  { %v139_v31 = vadd.f32 %v138_v30, %v137_v29  ;;  %v2003_v29 = vld [vmem:[#allocation8 + $0x10] sm:$0xff] }
  0x3d   :  { %v140_v32 = vmul.f32 %v139_v31, %v2297_v16 }
  0x3f   :  { %v141_v33 = vadd.f32 1e-05, %v140_v32 }
  0x41   :  { %2058 = vrsqrt.f32 %v141_v33  ;;  %vm148_vm2 = vweird.f32 %v141_v33 }
  0x47   :  { %v2059_v34 = vpop.eup %2058 }
  0x48   :  { %v143_v35 = vmul.f32 %v2059_v34, %v141_v33  ;;  %vm149_vm3 = vweird.f32 %v2059_v34 }
  0x49   :  { %vm150_vm4 = vmor %vm148_vm2, %vm149_vm3 }
  0x4a   :  { %v144_v36 = vmul.f32 %v2059_v34, %v143_v35 }
  0x4c   :  { %v145_v37 = vmul.f32 0.5, %v144_v36 }
  0x4e   :  { %v146_v39 = vsub.f32 1.5, %v145_v37 }
  0x50   :  { %v147_v40 = vmul.f32 %v2059_v34, %v146_v39 }
  0x52   :  { %v151_v42 = vsel %vm150_vm4, %v2059_v34, %v147_v40 }
  0x53   :  { %v152_v43 = vmul.f32 %v151_v42, %v127_v19  ;;  %v153_v44 = vmul.f32 %v151_v42, %v128_v20 }
  0x55   :  { %v155_v46 = vmul.f32 %v154_v41, %v152_v43  ;;  %v156_v47 = vmul.f32 %v154_v41, %v153_v44  ;;  %v252_v41 = vld [vmem:[#allocation10 + $0x4] sm:$0x7] }
  0x56   :  { %v290_v43 = vperm.slane %v252_v41, 0 }
  0x57   :  { %v158_v48 = vadd.f32 %v157_v45, %v155_v46  ;;  %v159_v49 = vadd.f32 %v157_v45, %v156_v47  ;;  %v293_v47 = vperm.slane %v252_v41, 1 }
  0x59   :  { %v160_v52 = vpack.c.bf16 %v159_v49, %v158_v48 }
  0x5b   :  { %172 = vmatpush.bf16.msra.mxu0 %v160_v52  ;;  %1777 = vmatmul.msk.bf16.vlgmr.msra.gmra.mxu1 %vm109_vm0, %v160_v52 }
  0x5e   :  { %1768 = vmatmul.msk.bf16.vlgmr.msra.gmra.mxu0 %vm161_vm5, %v2303_v53 }
  0x5f   :  { %343 = vmatpush.bf16.msrb.mxu0 %v2004_v27  ;;  %v2007_v27 = vld [vmem:[#allocation8 + $0x20] sm:$0xff] }
  0x63   :  { %344 = vmatpush.bf16.msrb.mxu0 %v2003_v29 }
  0xd8   :  { %v212_v61 = vpop.f32.mrf.mxu1 }
  0xdb   :  { %v174_v58 = vpop.f32.mrf.mxu0 }
  0xe0   :  { %v214_v2 = vpop.f32.mrf.mxu1 }
  0xe3   :  { %v176_v59 = vpop.f32.mrf.mxu0 }
  0xe4   :  { %v179_v60 = vpack.c.bf16 %v176_v59, %v174_v58 }
  0xe6   :  { %1786 = vmatmul.msk.bf16.vlgmr.msra.gmra.mxu2 %vm109_vm0, %v179_v60 }
 0x169   :  { %v241_v62 = vpop.f32.mrf.mxu2 }
 0x16a   :  { %v242_v63 = vadd.f32 %v241_v62, %v212_v61  ;;  %v380_v62 = vperm.slane %v252_v41, 2 }
 0x16c   :  { %v247_v1 = vadd.f32 %v246_v0, %v242_v63 }
 0x16e   :  { %v249_v5 = vmax.f32 %v247_v1, 0.0 }
 0x170   :  { %v253_v8 = vsel %vm109_vm0, %v249_v5, 0.0 }
 0x171   :  { %v243_v3 = vpop.f32.mrf.mxu2 }
 0x172   :  { %v244_v4 = vadd.f32 %v243_v3, %v214_v2 }
 0x174   :  { %v248_v6 = vadd.f32 %v246_v0, %v244_v4 }
 0x176   :  { %v250_v7 = vmax.f32 %v248_v6, 0.0 }
 0x178   :  { %v254_v9 = vsel %vm109_vm0, %v250_v7, 0.0 }
 0x179   :  { %v255_v10 = vadd.f32 %v254_v9, %v253_v8 }
 0x17b   :  { %v256_v11 = vrot.slane %v255_v10, 4 }
 0x17d   :  { %v257_v12 = vadd.f32 %v256_v11, %v255_v10 }
 0x17f   :  { %v258_v13 = vrot.slane %v257_v12, 2 }
 0x181   :  { %v259_v14 = vadd.f32 %v258_v13, %v257_v12 }
 0x183   :  { %v260_v15 = vrot.slane %v259_v14, 1 }
 0x185   :  { %v261_v17 = vadd.f32 %v260_v15, %v259_v14 }
 0x187   :  { %v262_v18 = vmul.f32 %v261_v17, %v2297_v16 }
 0x189   :  { %v263_v19 = vsub.f32 %v249_v5, %v262_v18  ;;  %v264_v20 = vsub.f32 %v250_v7, %v262_v18 }
 0x18b   :  { %v265_v21 = vmul.f32 %v263_v19, %v263_v19  ;;  %v266_v22 = vmul.f32 %v264_v20, %v264_v20 }
 0x18d   :  { %v267_v23 = vsel %vm109_vm0, %v265_v21, 0.0  ;;  %v268_v24 = vsel %vm109_vm0, %v266_v22, 0.0 }
 0x18e   :  { %v269_v25 = vadd.f32 %v268_v24, %v267_v23 }
 0x190   :  { %v270_v26 = vrot.slane %v269_v25, 4 }
 0x192   :  { %v271_v28 = vadd.f32 %v270_v26, %v269_v25  ;;  %v2008_v25 = vld [vmem:[#allocation8 + $0x28] sm:$0xff] }
 0x193   :  { %477 = vmatpush.bf16.msrb.mxu2 %v2008_v25 }
 0x194   :  { %v272_v30 = vrot.slane %v271_v28, 2 }
 0x196   :  { %v273_v31 = vadd.f32 %v272_v30, %v271_v28 }
 0x197   :  { %478 = vmatpush.bf16.msrb.mxu2 %v2007_v27 }
 0x198   :  { %v274_v32 = vrot.slane %v273_v31, 1 }
 0x19a   :  { %v275_v33 = vadd.f32 %v274_v32, %v273_v31 }
 0x19c   :  { %v276_v34 = vmul.f32 %v275_v33, %v2297_v16 }
 0x19e   :  { %v277_v35 = vadd.f32 1e-05, %v276_v34 }
 0x1a0   :  { %2060 = vrsqrt.f32 %v277_v35  ;;  %vm284_vm7 = vweird.f32 %v277_v35 }
 0x1a6   :  { %v2061_v36 = vpop.eup %2060 }
 0x1a7   :  { %v279_v37 = vmul.f32 %v2061_v36, %v277_v35  ;;  %vm285_vm6 = vweird.f32 %v2061_v36 }
 0x1a8   :  { %vm286_vm8 = vmor %vm284_vm7, %vm285_vm6 }
 0x1a9   :  { %v280_v38 = vmul.f32 %v2061_v36, %v279_v37 }
 0x1ab   :  { %v281_v39 = vmul.f32 0.5, %v280_v38 }
 0x1ad   :  { %v282_v40 = vsub.f32 1.5, %v281_v39  ;;  %v386_v39 = vld [vmem:[#allocation10 + $0x8] sm:$0x7] }
 0x1ae   :  { %v424_v41 = vperm.slane %v386_v39, 0 }
 0x1af   :  { %v283_v42 = vmul.f32 %v2061_v36, %v282_v40 }
 0x1b1   :  { %v287_v44 = vsel %vm286_vm8, %v2061_v36, %v283_v42 }
 0x1b2   :  { %v289_v45 = vmul.f32 %v287_v44, %v264_v20  ;;  %v288_v46 = vmul.f32 %v287_v44, %v263_v19 }
 0x1b4   :  { %v291_v48 = vmul.f32 %v290_v43, %v288_v46  ;;  %v292_v49 = vmul.f32 %v290_v43, %v289_v45  ;;  %v427_v45 = vperm.slane %v386_v39, 1 }
 0x1b6   :  { %v294_v50 = vadd.f32 %v293_v47, %v291_v48  ;;  %v295_v51 = vadd.f32 %v293_v47, %v292_v49 }
 0x1b8   :  { %v296_v52 = vpack.c.bf16 %v295_v51, %v294_v50  ;;  %v2006_v51 = vld [vmem:[#allocation7 + $0x28] sm:$0xff] }
 0x1b9   :  { %506 = vmatpush.bf16.msra.mxu0 %v2006_v51 }
 0x1ba   :  { %304 = vmatpush.bf16.msra.mxu3 %v296_v52  ;;  %1796 = vmatmul.msk.bf16.vlgmr.msrb.gmra.mxu0 %vm109_vm0, %v296_v52  ;;  %v2005_v52 = vld [vmem:[#allocation7 + $0x20] sm:$0xff] }
 0x1bd   :  { %1787 = vmatmul.msk.bf16.vlgmr.msra.gmra.mxu3 %vm161_vm5, %v2303_v53  ;;  %507 = vmatpush.bf16.msra.mxu0 %v2005_v52 }
 0x1be   :  { %372 = vmatpush.bf16.msrb.mxu3 %v2002_v54 }
 0x1c2   :  { %373 = vmatpush.bf16.msrb.mxu3 %v2001_v55 }
 0x237   :  { %v346_v59 = vpop.f32.mrf.mxu0 }
 0x23f   :  { %v348_v0 = vpop.f32.mrf.mxu0 }
 0x240   :  { %v306_v56 = vpop.f32.mrf.mxu3 }
 0x248   :  { %v308_v57 = vpop.f32.mrf.mxu3 }
 0x249   :  { %v311_v58 = vpack.c.bf16 %v308_v57, %v306_v56 }
 0x24b   :  { %1805 = vmatmul.msk.bf16.vlgmr.msrb.gmra.mxu3 %vm109_vm0, %v311_v58 }
 0x2ce   :  { %v375_v60 = vpop.f32.mrf.mxu3 }
 0x2cf   :  { %v376_v61 = vadd.f32 %v375_v60, %v346_v59  ;;  %v514_v60 = vperm.slane %v386_v39, 2 }
 0x2d1   :  { %v381_v63 = vadd.f32 %v380_v62, %v376_v61 }
 0x2d3   :  { %v383_v3 = vmax.f32 %v381_v63, 0.0 }
 0x2d5   :  { %v387_v6 = vsel %vm109_vm0, %v383_v3, 0.0 }
 0x2d6   :  { %v377_v1 = vpop.f32.mrf.mxu3 }
 0x2d7   :  { %v378_v2 = vadd.f32 %v377_v1, %v348_v0 }
 0x2d9   :  { %v382_v4 = vadd.f32 %v380_v62, %v378_v2 }
 0x2db   :  { %v384_v5 = vmax.f32 %v382_v4, 0.0 }
 0x2dd   :  { %v388_v7 = vsel %vm109_vm0, %v384_v5, 0.0 }
 0x2de   :  { %v389_v8 = vadd.f32 %v388_v7, %v387_v6 }
 0x2e0   :  { %v390_v9 = vrot.slane %v389_v8, 4 }
 0x2e2   :  { %v391_v10 = vadd.f32 %v390_v9, %v389_v8 }
 0x2e4   :  { %v392_v11 = vrot.slane %v391_v10, 2 }
 0x2e6   :  { %v393_v12 = vadd.f32 %v392_v11, %v391_v10 }
 0x2e8   :  { %v394_v13 = vrot.slane %v393_v12, 1 }
 0x2ea   :  { %v395_v14 = vadd.f32 %v394_v13, %v393_v12 }
 0x2ec   :  { %v396_v15 = vmul.f32 %v395_v14, %v2297_v16 }
 0x2ee   :  { %v397_v17 = vsub.f32 %v383_v3, %v396_v15  ;;  %v398_v18 = vsub.f32 %v384_v5, %v396_v15 }
 0x2f0   :  { %v399_v19 = vmul.f32 %v397_v17, %v397_v17  ;;  %v400_v20 = vmul.f32 %v398_v18, %v398_v18 }
 0x2f2   :  { %v401_v21 = vsel %vm109_vm0, %v399_v19, 0.0  ;;  %v402_v22 = vsel %vm109_vm0, %v400_v20, 0.0 }
 0x2f3   :  { %v403_v23 = vadd.f32 %v402_v22, %v401_v21 }
 0x2f5   :  { %v404_v24 = vrot.slane %v403_v23, 4 }
 0x2f7   :  { %v405_v26 = vadd.f32 %v404_v24, %v403_v23  ;;  %v2012_v23 = vld [vmem:[#allocation8 + $0x38] sm:$0xff] }
 0x2f9   :  { %v406_v28 = vrot.slane %v405_v26, 2 }
 0x2fb   :  { %v407_v29 = vadd.f32 %v406_v28, %v405_v26  ;;  %v2011_v26 = vld [vmem:[#allocation8 + $0x30] sm:$0xff] }
 0x2fd   :  { %v408_v30 = vrot.slane %v407_v29, 1 }
 0x2ff   :  { %v409_v31 = vadd.f32 %v408_v30, %v407_v29 }
 0x301   :  { %v410_v32 = vmul.f32 %v409_v31, %v2297_v16 }
 0x303   :  { %v411_v33 = vadd.f32 1e-05, %v410_v32 }
 0x305   :  { %2062 = vrsqrt.f32 %v411_v33  ;;  %vm418_vm10 = vweird.f32 %v411_v33 }
 0x30b   :  { %v2063_v34 = vpop.eup %2062 }
 0x30c   :  { %v413_v35 = vmul.f32 %v2063_v34, %v411_v33  ;;  %vm419_vm9 = vweird.f32 %v2063_v34 }
 0x30d   :  { %vm420_vm11 = vmor %vm418_vm10, %vm419_vm9 }
 0x30e   :  { %v414_v36 = vmul.f32 %v2063_v34, %v413_v35 }
 0x310   :  { %v415_v37 = vmul.f32 0.5, %v414_v36  ;;  %v520_v36 = vld [vmem:[#allocation10 + $0xc] sm:$0x7] }
 0x311   :  { %v558_v39 = vperm.slane %v520_v36, 0 }
 0x312   :  { %v416_v38 = vsub.f32 1.5, %v415_v37 }
 0x314   :  { %v417_v40 = vmul.f32 %v2063_v34, %v416_v38 }
 0x316   :  { %v421_v42 = vsel %vm420_vm11, %v2063_v34, %v417_v40 }
 0x317   :  { %v423_v43 = vmul.f32 %v421_v42, %v398_v18  ;;  %v422_v44 = vmul.f32 %v421_v42, %v397_v17 }
 0x319   :  { %v425_v46 = vmul.f32 %v424_v41, %v422_v44  ;;  %v426_v47 = vmul.f32 %v424_v41, %v423_v43  ;;  %v561_v43 = vperm.slane %v520_v36, 1 }
 0x31b   :  { %v428_v48 = vadd.f32 %v427_v45, %v425_v46  ;;  %v429_v49 = vadd.f32 %v427_v45, %v426_v47 }
 0x31d   :  { %v430_v50 = vpack.c.bf16 %v429_v49, %v428_v48  ;;  %v2010_v49 = vld [vmem:[#allocation7 + $0x38] sm:$0xff] }
 0x31e   :  { %640 = vmatpush.bf16.msra.mxu2 %v2010_v49 }
 0x31f   :  { %438 = vmatpush.bf16.msrb.mxu1 %v430_v50  ;;  %1815 = vmatmul.msk.bf16.vlgmr.msrb.gmra.mxu2 %vm109_vm0, %v430_v50  ;;  %v2009_v50 = vld [vmem:[#allocation7 + $0x30] sm:$0xff] }
 0x322   :  { %1806 = vmatmul.msk.bf16.vlgmr.msrb.gmra.mxu1 %vm161_vm5, %v2303_v53  ;;  %641 = vmatpush.bf16.msra.mxu2 %v2009_v50 }
 0x323   :  { %611 = vmatpush.bf16.msra.mxu1 %v2012_v23 }
 0x327   :  { %612 = vmatpush.bf16.msra.mxu1 %v2011_v26 }
 0x39f   :  { %v440_v54 = vpop.f32.mrf.mxu1 }
 0x3a2   :  { %v480_v57 = vpop.f32.mrf.mxu2 }
 0x3a7   :  { %v442_v55 = vpop.f32.mrf.mxu1 }
 0x3a8   :  { %v445_v56 = vpack.c.bf16 %v442_v55, %v440_v54 }
 0x3aa   :  { %1824 = vmatmul.msk.bf16.vlgmr.msra.gmra.mxu0 %vm109_vm0, %v445_v56  ;;  %v482_v62 = vpop.f32.mrf.mxu2 }
 0x427   :  { %v509_v58 = vpop.f32.mrf.mxu0 }
 0x428   :  { %v510_v59 = vadd.f32 %v509_v58, %v480_v57  ;;  %v648_v58 = vperm.slane %v520_v36, 2 }
 0x42a   :  { %v515_v61 = vadd.f32 %v514_v60, %v510_v59 }
 0x42c   :  { %v517_v1 = vmax.f32 %v515_v61, 0.0 }
 0x42e   :  { %v521_v4 = vsel %vm109_vm0, %v517_v1, 0.0 }
 0x42f   :  { %v511_v63 = vpop.f32.mrf.mxu0 }
 0x430   :  { %v512_v0 = vadd.f32 %v511_v63, %v482_v62 }
 0x432   :  { %v516_v2 = vadd.f32 %v514_v60, %v512_v0 }
 0x434   :  { %v518_v3 = vmax.f32 %v516_v2, 0.0 }
 0x436   :  { %v522_v5 = vsel %vm109_vm0, %v518_v3, 0.0 }
 0x437   :  { %v523_v6 = vadd.f32 %v522_v5, %v521_v4 }
 0x439   :  { %v524_v7 = vrot.slane %v523_v6, 4 }
 0x43b   :  { %v525_v8 = vadd.f32 %v524_v7, %v523_v6 }
 0x43d   :  { %v526_v9 = vrot.slane %v525_v8, 2 }
 0x43f   :  { %v527_v10 = vadd.f32 %v526_v9, %v525_v8 }
 0x441   :  { %v528_v11 = vrot.slane %v527_v10, 1 }
 0x443   :  { %v529_v12 = vadd.f32 %v528_v11, %v527_v10 }
 0x445   :  { %v530_v13 = vmul.f32 %v529_v12, %v2297_v16 }
 0x447   :  { %v531_v14 = vsub.f32 %v517_v1, %v530_v13  ;;  %v532_v15 = vsub.f32 %v518_v3, %v530_v13 }
 0x449   :  { %v533_v17 = vmul.f32 %v531_v14, %v531_v14  ;;  %v534_v18 = vmul.f32 %v532_v15, %v532_v15 }
 0x44b   :  { %v535_v19 = vsel %vm109_vm0, %v533_v17, 0.0  ;;  %v536_v20 = vsel %vm109_vm0, %v534_v18, 0.0 }
 0x44c   :  { %v537_v21 = vadd.f32 %v536_v20, %v535_v19 }
 0x44e   :  { %v538_v22 = vrot.slane %v537_v21, 4 }
 0x450   :  { %v539_v24 = vadd.f32 %v538_v22, %v537_v21  ;;  %v2016_v21 = vld [vmem:[#allocation8 + $0x48] sm:$0xff] }
 0x452   :  { %v540_v25 = vrot.slane %v539_v24, 2 }
 0x454   :  { %v541_v27 = vadd.f32 %v540_v25, %v539_v24  ;;  %v2015_v24 = vld [vmem:[#allocation8 + $0x40] sm:$0xff] }
 0x456   :  { %v542_v28 = vrot.slane %v541_v27, 1 }
 0x458   :  { %v543_v29 = vadd.f32 %v542_v28, %v541_v27 }
 0x45a   :  { %v544_v30 = vmul.f32 %v543_v29, %v2297_v16 }
 0x45c   :  { %v545_v31 = vadd.f32 1e-05, %v544_v30 }
 0x45e   :  { %2064 = vrsqrt.f32 %v545_v31  ;;  %vm552_vm13 = vweird.f32 %v545_v31 }
 0x464   :  { %v2065_v32 = vpop.eup %2064 }
 0x465   :  { %v547_v33 = vmul.f32 %v2065_v32, %v545_v31  ;;  %vm553_vm12 = vweird.f32 %v2065_v32 }
 0x466   :  { %vm554_vm14 = vmor %vm552_vm13, %vm553_vm12 }
 0x467   :  { %v548_v34 = vmul.f32 %v2065_v32, %v547_v33 }
 0x469   :  { %v549_v35 = vmul.f32 0.5, %v548_v34  ;;  %v654_v34 = vld [vmem:[#allocation10 + $0x10] sm:$0x7] }
 0x46b   :  { %v550_v37 = vsub.f32 1.5, %v549_v35 }
 0x46d   :  { %v551_v38 = vmul.f32 %v2065_v32, %v550_v37  ;;  %v692_v37 = vperm.slane %v654_v34, 0 }
 0x46f   :  { %v555_v40 = vsel %vm554_vm14, %v2065_v32, %v551_v38 }
 0x470   :  { %v556_v41 = vmul.f32 %v555_v40, %v531_v14  ;;  %v557_v42 = vmul.f32 %v555_v40, %v532_v15 }
 0x472   :  { %v559_v44 = vmul.f32 %v558_v39, %v556_v41  ;;  %v560_v45 = vmul.f32 %v558_v39, %v557_v42  ;;  %v695_v41 = vperm.slane %v654_v34, 1 }
 0x474   :  { %v562_v46 = vadd.f32 %v561_v43, %v559_v44  ;;  %v563_v47 = vadd.f32 %v561_v43, %v560_v45 }
 0x476   :  { %v564_v48 = vpack.c.bf16 %v563_v47, %v562_v46  ;;  %v2014_v47 = vld [vmem:[#allocation7 + $0x48] sm:$0xff] }
 0x477   :  { %774 = vmatpush.bf16.msrb.mxu1 %v2014_v47 }
 0x478   :  { %572 = vmatpush.bf16.msra.mxu3 %v564_v48  ;;  %1834 = vmatmul.msk.bf16.vlgmr.msra.gmra.mxu1 %vm109_vm0, %v564_v48  ;;  %v2013_v48 = vld [vmem:[#allocation7 + $0x40] sm:$0xff] }
 0x47b   :  { %1825 = vmatmul.msk.bf16.vlgmr.msra.gmra.mxu3 %vm161_vm5, %v2303_v53  ;;  %775 = vmatpush.bf16.msrb.mxu1 %v2013_v48 }
 0x47c   :  { %745 = vmatpush.bf16.msrb.mxu3 %v2016_v21 }
 0x480   :  { %746 = vmatpush.bf16.msrb.mxu3 %v2015_v24 }
 0x4f5   :  { %v614_v55 = vpop.f32.mrf.mxu1 }
 0x4fd   :  { %v616_v60 = vpop.f32.mrf.mxu1 }
 0x4fe   :  { %v574_v51 = vpop.f32.mrf.mxu3 }
 0x506   :  { %v576_v52 = vpop.f32.mrf.mxu3 }
 0x507   :  { %v579_v54 = vpack.c.bf16 %v576_v52, %v574_v51 }
 0x509   :  { %1843 = vmatmul.msk.bf16.vlgmr.msra.gmra.mxu2 %vm109_vm0, %v579_v54 }
 0x58c   :  { %v643_v56 = vpop.f32.mrf.mxu2 }
 0x58d   :  { %v644_v57 = vadd.f32 %v643_v56, %v614_v55  ;;  %v782_v56 = vperm.slane %v654_v34, 2 }
 0x58f   :  { %v649_v59 = vadd.f32 %v648_v58, %v644_v57 }
 0x591   :  { %v651_v63 = vmax.f32 %v649_v59, 0.0 }
 0x593   :  { %v655_v2 = vsel %vm109_vm0, %v651_v63, 0.0 }
 0x594   :  { %v645_v61 = vpop.f32.mrf.mxu2 }
 0x595   :  { %v646_v62 = vadd.f32 %v645_v61, %v616_v60 }
 0x597   :  { %v650_v0 = vadd.f32 %v648_v58, %v646_v62 }
 0x599   :  { %v652_v1 = vmax.f32 %v650_v0, 0.0 }
 0x59b   :  { %v656_v3 = vsel %vm109_vm0, %v652_v1, 0.0 }
 0x59c   :  { %v657_v4 = vadd.f32 %v656_v3, %v655_v2 }
 0x59e   :  { %v658_v5 = vrot.slane %v657_v4, 4 }
 0x5a0   :  { %v659_v6 = vadd.f32 %v658_v5, %v657_v4 }
 0x5a2   :  { %v660_v7 = vrot.slane %v659_v6, 2 }
 0x5a4   :  { %v661_v8 = vadd.f32 %v660_v7, %v659_v6 }
 0x5a6   :  { %v662_v9 = vrot.slane %v661_v8, 1 }
 0x5a8   :  { %v663_v10 = vadd.f32 %v662_v9, %v661_v8 }
 0x5aa   :  { %v664_v11 = vmul.f32 %v663_v10, %v2297_v16 }
 0x5ac   :  { %v665_v12 = vsub.f32 %v651_v63, %v664_v11  ;;  %v666_v13 = vsub.f32 %v652_v1, %v664_v11 }
 0x5ae   :  { %v667_v14 = vmul.f32 %v665_v12, %v665_v12  ;;  %v668_v15 = vmul.f32 %v666_v13, %v666_v13 }
 0x5b0   :  { %v669_v17 = vsel %vm109_vm0, %v667_v14, 0.0  ;;  %v670_v18 = vsel %vm109_vm0, %v668_v15, 0.0 }
 0x5b1   :  { %v671_v19 = vadd.f32 %v670_v18, %v669_v17 }
 0x5b3   :  { %v672_v20 = vrot.slane %v671_v19, 4 }
 0x5b5   :  { %v673_v22 = vadd.f32 %v672_v20, %v671_v19  ;;  %v2020_v19 = vld [vmem:[#allocation8 + $0x58] sm:$0xff] }
 0x5b7   :  { %v674_v23 = vrot.slane %v673_v22, 2 }
 0x5b9   :  { %v675_v25 = vadd.f32 %v674_v23, %v673_v22  ;;  %v2019_v22 = vld [vmem:[#allocation8 + $0x50] sm:$0xff] }
 0x5bb   :  { %v676_v26 = vrot.slane %v675_v25, 1 }
 0x5bd   :  { %v677_v27 = vadd.f32 %v676_v26, %v675_v25 }
 0x5bf   :  { %v678_v28 = vmul.f32 %v677_v27, %v2297_v16 }
 0x5c1   :  { %v679_v29 = vadd.f32 1e-05, %v678_v28 }
 0x5c3   :  { %2066 = vrsqrt.f32 %v679_v29  ;;  %vm686_vm1 = vweird.f32 %v679_v29 }
 0x5c9   :  { %v2067_v30 = vpop.eup %2066 }
 0x5ca   :  { %v681_v31 = vmul.f32 %v2067_v30, %v679_v29  ;;  %vm687_vm15 = vweird.f32 %v2067_v30 }
 0x5cb   :  { %vm688_vm2 = vmor %vm686_vm1, %vm687_vm15 }
 0x5cc   :  { %v682_v32 = vmul.f32 %v2067_v30, %v681_v31 }
 0x5ce   :  { %v683_v33 = vmul.f32 0.5, %v682_v32  ;;  %v788_v32 = vld [vmem:[#allocation10 + $0x14] sm:$0x7] }
 0x5d0   :  { %v684_v35 = vsub.f32 1.5, %v683_v33 }
 0x5d2   :  { %v685_v36 = vmul.f32 %v2067_v30, %v684_v35  ;;  %v826_v35 = vperm.slane %v788_v32, 0 }
 0x5d4   :  { %v689_v38 = vsel %vm688_vm2, %v2067_v30, %v685_v36 }
 0x5d5   :  { %v690_v39 = vmul.f32 %v689_v38, %v665_v12  ;;  %v691_v40 = vmul.f32 %v689_v38, %v666_v13 }
 0x5d7   :  { %v693_v42 = vmul.f32 %v692_v37, %v690_v39  ;;  %v694_v43 = vmul.f32 %v692_v37, %v691_v40  ;;  %v829_v39 = vperm.slane %v788_v32, 1 }
 0x5d9   :  { %v696_v44 = vadd.f32 %v695_v41, %v693_v42  ;;  %v697_v45 = vadd.f32 %v695_v41, %v694_v43 }
 0x5db   :  { %v698_v46 = vpack.c.bf16 %v697_v45, %v696_v44  ;;  %v2018_v45 = vld [vmem:[#allocation7 + $0x58] sm:$0xff] }
 0x5dc   :  { %908 = vmatpush.bf16.msra.mxu3 %v2018_v45 }
 0x5dd   :  { %706 = vmatpush.bf16.msrb.mxu0 %v698_v46  ;;  %1853 = vmatmul.msk.bf16.vlgmr.msrb.gmra.mxu3 %vm109_vm0, %v698_v46  ;;  %v2017_v46 = vld [vmem:[#allocation7 + $0x50] sm:$0xff] }
 0x5e0   :  { %1844 = vmatmul.msk.bf16.vlgmr.msrb.gmra.mxu0 %vm161_vm5, %v2303_v53  ;;  %909 = vmatpush.bf16.msra.mxu3 %v2017_v46 }
 0x5e1   :  { %879 = vmatpush.bf16.msra.mxu0 %v2020_v19 }
 0x5e5   :  { %880 = vmatpush.bf16.msra.mxu0 %v2019_v22 }
 0x65d   :  { %v708_v49 = vpop.f32.mrf.mxu0 }
 0x660   :  { %v748_v52 = vpop.f32.mrf.mxu3 }
 0x665   :  { %v710_v50 = vpop.f32.mrf.mxu0 }
 0x666   :  { %v713_v51 = vpack.c.bf16 %v710_v50, %v708_v49 }
 0x668   :  { %1862 = vmatmul.msk.bf16.vlgmr.msrb.gmra.mxu1 %vm109_vm0, %v713_v51  ;;  %v750_v58 = vpop.f32.mrf.mxu3 }
 0x6e5   :  { %v777_v54 = vpop.f32.mrf.mxu1 }
 0x6e6   :  { %v778_v55 = vadd.f32 %v777_v54, %v748_v52  ;;  %v916_v54 = vperm.slane %v788_v32, 2 }
 0x6e8   :  { %v783_v57 = vadd.f32 %v782_v56, %v778_v55 }
 0x6ea   :  { %v785_v61 = vmax.f32 %v783_v57, 0.0 }
 0x6ec   :  { %v789_v0 = vsel %vm109_vm0, %v785_v61, 0.0 }
 0x6ed   :  { %v779_v59 = vpop.f32.mrf.mxu1 }
 0x6ee   :  { %v780_v60 = vadd.f32 %v779_v59, %v750_v58 }
 0x6f0   :  { %v784_v62 = vadd.f32 %v782_v56, %v780_v60 }
 0x6f2   :  { %v786_v63 = vmax.f32 %v784_v62, 0.0 }
 0x6f4   :  { %v790_v1 = vsel %vm109_vm0, %v786_v63, 0.0 }
 0x6f5   :  { %v791_v2 = vadd.f32 %v790_v1, %v789_v0 }
 0x6f7   :  { %v792_v3 = vrot.slane %v791_v2, 4 }
 0x6f9   :  { %v793_v4 = vadd.f32 %v792_v3, %v791_v2 }
 0x6fb   :  { %v794_v5 = vrot.slane %v793_v4, 2 }
 0x6fd   :  { %v795_v6 = vadd.f32 %v794_v5, %v793_v4 }
 0x6ff   :  { %v796_v7 = vrot.slane %v795_v6, 1 }
 0x701   :  { %v797_v8 = vadd.f32 %v796_v7, %v795_v6 }
 0x703   :  { %v798_v9 = vmul.f32 %v797_v8, %v2297_v16 }
 0x705   :  { %v799_v10 = vsub.f32 %v785_v61, %v798_v9  ;;  %v800_v11 = vsub.f32 %v786_v63, %v798_v9 }
 0x707   :  { %v801_v12 = vmul.f32 %v799_v10, %v799_v10  ;;  %v802_v13 = vmul.f32 %v800_v11, %v800_v11 }
 0x709   :  { %v803_v14 = vsel %vm109_vm0, %v801_v12, 0.0  ;;  %v804_v15 = vsel %vm109_vm0, %v802_v13, 0.0 }
 0x70a   :  { %v805_v17 = vadd.f32 %v804_v15, %v803_v14 }
 0x70c   :  { %v806_v18 = vrot.slane %v805_v17, 4 }
 0x70e   :  { %v807_v20 = vadd.f32 %v806_v18, %v805_v17  ;;  %v2024_v17 = vld [vmem:[#allocation8 + $0x68] sm:$0xff] }
 0x710   :  { %v808_v21 = vrot.slane %v807_v20, 2 }
 0x712   :  { %v809_v23 = vadd.f32 %v808_v21, %v807_v20  ;;  %v2023_v20 = vld [vmem:[#allocation8 + $0x60] sm:$0xff] }
 0x714   :  { %v810_v24 = vrot.slane %v809_v23, 1 }
 0x716   :  { %v811_v25 = vadd.f32 %v810_v24, %v809_v23 }
 0x718   :  { %v812_v26 = vmul.f32 %v811_v25, %v2297_v16 }
 0x71a   :  { %v813_v27 = vadd.f32 1e-05, %v812_v26 }
 0x71c   :  { %2068 = vrsqrt.f32 %v813_v27  ;;  %vm820_vm4 = vweird.f32 %v813_v27 }
 0x722   :  { %v2069_v28 = vpop.eup %2068 }
 0x723   :  { %v815_v29 = vmul.f32 %v2069_v28, %v813_v27  ;;  %vm821_vm3 = vweird.f32 %v2069_v28 }
 0x724   :  { %vm822_vm6 = vmor %vm820_vm4, %vm821_vm3 }
 0x725   :  { %v816_v30 = vmul.f32 %v2069_v28, %v815_v29 }
 0x727   :  { %v817_v31 = vmul.f32 0.5, %v816_v30  ;;  %v922_v30 = vld [vmem:[#allocation10 + $0x18] sm:$0x7] }
 0x729   :  { %v818_v33 = vsub.f32 1.5, %v817_v31 }
 0x72b   :  { %v819_v34 = vmul.f32 %v2069_v28, %v818_v33  ;;  %v960_v33 = vperm.slane %v922_v30, 0 }
 0x72d   :  { %v823_v36 = vsel %vm822_vm6, %v2069_v28, %v819_v34 }
 0x72e   :  { %v824_v37 = vmul.f32 %v823_v36, %v799_v10  ;;  %v825_v38 = vmul.f32 %v823_v36, %v800_v11 }
 0x730   :  { %v827_v40 = vmul.f32 %v826_v35, %v824_v37  ;;  %v828_v41 = vmul.f32 %v826_v35, %v825_v38  ;;  %v963_v37 = vperm.slane %v922_v30, 1 }
 0x732   :  { %v830_v42 = vadd.f32 %v829_v39, %v827_v40  ;;  %v831_v43 = vadd.f32 %v829_v39, %v828_v41 }
 0x734   :  { %v832_v44 = vpack.c.bf16 %v831_v43, %v830_v42  ;;  %v2022_v43 = vld [vmem:[#allocation7 + $0x68] sm:$0xff] }
 0x735   :  { %1042 = vmatpush.bf16.msrb.mxu0 %v2022_v43 }
 0x736   :  { %840 = vmatpush.bf16.msrb.mxu2 %v832_v44  ;;  %1872 = vmatmul.msk.bf16.vlgmr.msra.gmra.mxu0 %vm109_vm0, %v832_v44  ;;  %v2021_v44 = vld [vmem:[#allocation7 + $0x60] sm:$0xff] }
 0x739   :  { %1863 = vmatmul.msk.bf16.vlgmr.msrb.gmra.mxu2 %vm161_vm5, %v2303_v53  ;;  %1043 = vmatpush.bf16.msrb.mxu0 %v2021_v44 }
 0x73a   :  { %1013 = vmatpush.bf16.msra.mxu2 %v2024_v17 }
 0x73e   :  { %1014 = vmatpush.bf16.msra.mxu2 %v2023_v20 }
 0x7b3   :  { %v882_v50 = vpop.f32.mrf.mxu0 }
 0x7bb   :  { %v884_v56 = vpop.f32.mrf.mxu0 }
 0x7bc   :  { %v842_v47 = vpop.f32.mrf.mxu2 }
 0x7c4   :  { %v844_v48 = vpop.f32.mrf.mxu2 }
 0x7c5   :  { %v847_v49 = vpack.c.bf16 %v844_v48, %v842_v47 }
 0x7c7   :  { %1881 = vmatmul.msk.bf16.vlgmr.msra.gmra.mxu3 %vm109_vm0, %v847_v49 }
 0x84a   :  { %v911_v51 = vpop.f32.mrf.mxu3 }
 0x84b   :  { %v912_v52 = vadd.f32 %v911_v51, %v882_v50  ;;  %v1050_v51 = vperm.slane %v922_v30, 2 }
 0x84d   :  { %v917_v55 = vadd.f32 %v916_v54, %v912_v52 }
 0x84f   :  { %v919_v59 = vmax.f32 %v917_v55, 0.0 }
 0x851   :  { %v923_v62 = vsel %vm109_vm0, %v919_v59, 0.0 }
 0x852   :  { %v913_v57 = vpop.f32.mrf.mxu3 }
 0x853   :  { %v914_v58 = vadd.f32 %v913_v57, %v884_v56 }
 0x855   :  { %v918_v60 = vadd.f32 %v916_v54, %v914_v58 }
 0x857   :  { %v920_v61 = vmax.f32 %v918_v60, 0.0 }
 0x859   :  { %v924_v63 = vsel %vm109_vm0, %v920_v61, 0.0 }
 0x85a   :  { %v925_v0 = vadd.f32 %v924_v63, %v923_v62 }
 0x85c   :  { %v926_v1 = vrot.slane %v925_v0, 4 }
 0x85e   :  { %v927_v2 = vadd.f32 %v926_v1, %v925_v0 }
 0x860   :  { %v928_v3 = vrot.slane %v927_v2, 2 }
 0x862   :  { %v929_v4 = vadd.f32 %v928_v3, %v927_v2 }
 0x864   :  { %v930_v5 = vrot.slane %v929_v4, 1 }
 0x866   :  { %v931_v6 = vadd.f32 %v930_v5, %v929_v4 }
 0x868   :  { %v932_v7 = vmul.f32 %v931_v6, %v2297_v16 }
 0x86a   :  { %v933_v8 = vsub.f32 %v919_v59, %v932_v7  ;;  %v934_v9 = vsub.f32 %v920_v61, %v932_v7 }
 0x86c   :  { %v935_v10 = vmul.f32 %v933_v8, %v933_v8  ;;  %v936_v11 = vmul.f32 %v934_v9, %v934_v9 }
 0x86e   :  { %v937_v12 = vsel %vm109_vm0, %v935_v10, 0.0  ;;  %v938_v13 = vsel %vm109_vm0, %v936_v11, 0.0 }
 0x86f   :  { %v939_v14 = vadd.f32 %v938_v13, %v937_v12 }
 0x871   :  { %v940_v15 = vrot.slane %v939_v14, 4 }
 0x873   :  { %v941_v18 = vadd.f32 %v940_v15, %v939_v14  ;;  %v2028_v14 = vld [vmem:[#allocation8 + $0x78] sm:$0xff] }
 0x875   :  { %v942_v19 = vrot.slane %v941_v18, 2 }
 0x877   :  { %v943_v21 = vadd.f32 %v942_v19, %v941_v18  ;;  %v2027_v18 = vld [vmem:[#allocation8 + $0x70] sm:$0xff] }
 0x879   :  { %v944_v22 = vrot.slane %v943_v21, 1 }
 0x87b   :  { %v945_v23 = vadd.f32 %v944_v22, %v943_v21 }
 0x87d   :  { %v946_v24 = vmul.f32 %v945_v23, %v2297_v16 }
 0x87f   :  { %v947_v25 = vadd.f32 1e-05, %v946_v24 }
 0x881   :  { %2070 = vrsqrt.f32 %v947_v25  ;;  %vm954_vm8 = vweird.f32 %v947_v25 }
 0x887   :  { %v2071_v26 = vpop.eup %2070 }
 0x888   :  { %v949_v27 = vmul.f32 %v2071_v26, %v947_v25  ;;  %vm955_vm7 = vweird.f32 %v2071_v26 }
 0x889   :  { %vm956_vm9 = vmor %vm954_vm8, %vm955_vm7 }
 0x88a   :  { %v950_v28 = vmul.f32 %v2071_v26, %v949_v27 }
 0x88c   :  { %v951_v29 = vmul.f32 0.5, %v950_v28  ;;  %v1056_v28 = vld [vmem:[#allocation10 + $0x1c] sm:$0x7] }
 0x88e   :  { %v952_v31 = vsub.f32 1.5, %v951_v29 }
 0x890   :  { %v953_v32 = vmul.f32 %v2071_v26, %v952_v31  ;;  %v1094_v31 = vperm.slane %v1056_v28, 0 }
 0x892   :  { %v957_v34 = vsel %vm956_vm9, %v2071_v26, %v953_v32 }
 0x893   :  { %v958_v35 = vmul.f32 %v957_v34, %v933_v8  ;;  %v959_v36 = vmul.f32 %v957_v34, %v934_v9 }
 0x895   :  { %v961_v38 = vmul.f32 %v960_v33, %v958_v35  ;;  %v962_v39 = vmul.f32 %v960_v33, %v959_v36  ;;  %v1097_v35 = vperm.slane %v1056_v28, 1 }
 0x897   :  { %v964_v40 = vadd.f32 %v963_v37, %v961_v38  ;;  %v965_v41 = vadd.f32 %v963_v37, %v962_v39 }
 0x899   :  { %v966_v42 = vpack.c.bf16 %v965_v41, %v964_v40  ;;  %v2026_v41 = vld [vmem:[#allocation7 + $0x78] sm:$0xff] }
 0x89a   :  { %1176 = vmatpush.bf16.msrb.mxu2 %v2026_v41 }
 0x89b   :  { %974 = vmatpush.bf16.msra.mxu1 %v966_v42  ;;  %1891 = vmatmul.msk.bf16.vlgmr.msra.gmra.mxu2 %vm109_vm0, %v966_v42  ;;  %v2025_v42 = vld [vmem:[#allocation7 + $0x70] sm:$0xff] }
 0x89e   :  { %1882 = vmatmul.msk.bf16.vlgmr.msra.gmra.mxu1 %vm161_vm5, %v2303_v53  ;;  %1177 = vmatpush.bf16.msrb.mxu2 %v2025_v42 }
 0x89f   :  { %1147 = vmatpush.bf16.msrb.mxu1 %v2028_v14 }
 0x8a3   :  { %1148 = vmatpush.bf16.msrb.mxu1 %v2027_v18 }
 0x91b   :  { %v976_v45 = vpop.f32.mrf.mxu1 }
 0x91e   :  { %v1016_v48 = vpop.f32.mrf.mxu2 }
 0x923   :  { %v978_v46 = vpop.f32.mrf.mxu1 }
 0x924   :  { %v981_v47 = vpack.c.bf16 %v978_v46, %v976_v45 }
 0x926   :  { %1900 = vmatmul.msk.bf16.vlgmr.msrb.gmra.mxu0 %vm109_vm0, %v981_v47  ;;  %v1018_v54 = vpop.f32.mrf.mxu2 }
 0x9a3   :  { %v1045_v49 = vpop.f32.mrf.mxu0 }
 0x9a4   :  { %v1046_v50 = vadd.f32 %v1045_v49, %v1016_v48  ;;  %v1184_v49 = vperm.slane %v1056_v28, 2 }
 0x9a6   :  { %v1051_v52 = vadd.f32 %v1050_v51, %v1046_v50 }
 0x9a8   :  { %v1053_v57 = vmax.f32 %v1051_v52, 0.0 }
 0x9aa   :  { %v1057_v60 = vsel %vm109_vm0, %v1053_v57, 0.0 }
 0x9ab   :  { %v1047_v55 = vpop.f32.mrf.mxu0 }
 0x9ac   :  { %v1048_v56 = vadd.f32 %v1047_v55, %v1018_v54 }
 0x9ae   :  { %v1052_v58 = vadd.f32 %v1050_v51, %v1048_v56 }
 0x9b0   :  { %v1054_v59 = vmax.f32 %v1052_v58, 0.0 }
 0x9b2   :  { %v1058_v61 = vsel %vm109_vm0, %v1054_v59, 0.0 }
 0x9b3   :  { %v1059_v62 = vadd.f32 %v1058_v61, %v1057_v60 }
 0x9b5   :  { %v1060_v63 = vrot.slane %v1059_v62, 4 }
 0x9b7   :  { %v1061_v0 = vadd.f32 %v1060_v63, %v1059_v62 }
 0x9b9   :  { %v1062_v1 = vrot.slane %v1061_v0, 2 }
 0x9bb   :  { %v1063_v2 = vadd.f32 %v1062_v1, %v1061_v0 }
 0x9bd   :  { %v1064_v3 = vrot.slane %v1063_v2, 1 }
 0x9bf   :  { %v1065_v4 = vadd.f32 %v1064_v3, %v1063_v2 }
 0x9c1   :  { %v1066_v5 = vmul.f32 %v1065_v4, %v2297_v16 }
 0x9c3   :  { %v1067_v6 = vsub.f32 %v1053_v57, %v1066_v5  ;;  %v1068_v7 = vsub.f32 %v1054_v59, %v1066_v5 }
 0x9c5   :  { %v1069_v8 = vmul.f32 %v1067_v6, %v1067_v6  ;;  %v1070_v9 = vmul.f32 %v1068_v7, %v1068_v7 }
 0x9c7   :  { %v1071_v10 = vsel %vm109_vm0, %v1069_v8, 0.0  ;;  %v1072_v11 = vsel %vm109_vm0, %v1070_v9, 0.0 }
 0x9c8   :  { %v1073_v12 = vadd.f32 %v1072_v11, %v1071_v10 }
 0x9ca   :  { %v1074_v13 = vrot.slane %v1073_v12, 4 }
 0x9cc   :  { %v1075_v15 = vadd.f32 %v1074_v13, %v1073_v12  ;;  %v2032_v12 = vld [vmem:[#allocation8 + $0x88] sm:$0xff] }
 0x9ce   :  { %v1076_v17 = vrot.slane %v1075_v15, 2 }
 0x9d0   :  { %v1077_v19 = vadd.f32 %v1076_v17, %v1075_v15  ;;  %v2031_v15 = vld [vmem:[#allocation8 + $0x80] sm:$0xff] }
 0x9d2   :  { %v1078_v20 = vrot.slane %v1077_v19, 1 }
 0x9d4   :  { %v1079_v21 = vadd.f32 %v1078_v20, %v1077_v19 }
 0x9d6   :  { %v1080_v22 = vmul.f32 %v1079_v21, %v2297_v16 }
 0x9d8   :  { %v1081_v23 = vadd.f32 1e-05, %v1080_v22 }
 0x9da   :  { %2072 = vrsqrt.f32 %v1081_v23  ;;  %vm1088_vm11 = vweird.f32 %v1081_v23 }
 0x9e0   :  { %v2073_v24 = vpop.eup %2072 }
 0x9e1   :  { %v1083_v25 = vmul.f32 %v2073_v24, %v1081_v23  ;;  %vm1089_vm10 = vweird.f32 %v2073_v24 }
 0x9e2   :  { %vm1090_vm12 = vmor %vm1088_vm11, %vm1089_vm10 }
 0x9e3   :  { %v1084_v26 = vmul.f32 %v2073_v24, %v1083_v25 }
 0x9e5   :  { %v1085_v27 = vmul.f32 0.5, %v1084_v26  ;;  %v1190_v26 = vld [vmem:[#allocation10 + $0x20] sm:$0x7] }
 0x9e7   :  { %v1086_v29 = vsub.f32 1.5, %v1085_v27 }
 0x9e9   :  { %v1087_v30 = vmul.f32 %v2073_v24, %v1086_v29  ;;  %v1228_v29 = vperm.slane %v1190_v26, 0 }
 0x9eb   :  { %v1091_v32 = vsel %vm1090_vm12, %v2073_v24, %v1087_v30 }
 0x9ec   :  { %v1092_v33 = vmul.f32 %v1091_v32, %v1067_v6  ;;  %v1093_v34 = vmul.f32 %v1091_v32, %v1068_v7 }
 0x9ee   :  { %v1095_v36 = vmul.f32 %v1094_v31, %v1092_v33  ;;  %v1096_v37 = vmul.f32 %v1094_v31, %v1093_v34  ;;  %v1231_v33 = vperm.slane %v1190_v26, 1 }
 0x9f0   :  { %v1098_v38 = vadd.f32 %v1097_v35, %v1095_v36  ;;  %v1099_v39 = vadd.f32 %v1097_v35, %v1096_v37 }
 0x9f2   :  { %v1100_v40 = vpack.c.bf16 %v1099_v39, %v1098_v38  ;;  %v2030_v39 = vld [vmem:[#allocation7 + $0x88] sm:$0xff] }
 0x9f3   :  { %1310 = vmatpush.bf16.msra.mxu1 %v2030_v39 }
 0x9f4   :  { %1108 = vmatpush.bf16.msrb.mxu3 %v1100_v40  ;;  %1910 = vmatmul.msk.bf16.vlgmr.msrb.gmra.mxu1 %vm109_vm0, %v1100_v40  ;;  %v2029_v40 = vld [vmem:[#allocation7 + $0x80] sm:$0xff] }
 0x9f7   :  { %1901 = vmatmul.msk.bf16.vlgmr.msrb.gmra.mxu3 %vm161_vm5, %v2303_v53  ;;  %1311 = vmatpush.bf16.msra.mxu1 %v2029_v40 }
 0x9f8   :  { %1281 = vmatpush.bf16.msra.mxu3 %v2032_v12 }
 0x9fc   :  { %1282 = vmatpush.bf16.msra.mxu3 %v2031_v15 }
 0xa71   :  { %v1150_v46 = vpop.f32.mrf.mxu1 }
 0xa79   :  { %v1152_v51 = vpop.f32.mrf.mxu1 }
 0xa7a   :  { %v1110_v43 = vpop.f32.mrf.mxu3 }
 0xa82   :  { %v1112_v44 = vpop.f32.mrf.mxu3 }
 0xa83   :  { %v1115_v45 = vpack.c.bf16 %v1112_v44, %v1110_v43 }
 0xa85   :  { %1919 = vmatmul.msk.bf16.vlgmr.msrb.gmra.mxu2 %vm109_vm0, %v1115_v45 }
 0xb08   :  { %v1179_v47 = vpop.f32.mrf.mxu2 }
 0xb09   :  { %v1180_v48 = vadd.f32 %v1179_v47, %v1150_v46  ;;  %v1318_v47 = vperm.slane %v1190_v26, 2 }
 0xb0b   :  { %v1185_v50 = vadd.f32 %v1184_v49, %v1180_v48 }
 0xb0d   :  { %v1187_v55 = vmax.f32 %v1185_v50, 0.0 }
 0xb0f   :  { %v1191_v58 = vsel %vm109_vm0, %v1187_v55, 0.0 }
 0xb10   :  { %v1181_v52 = vpop.f32.mrf.mxu2 }
 0xb11   :  { %v1182_v54 = vadd.f32 %v1181_v52, %v1152_v51 }
 0xb13   :  { %v1186_v56 = vadd.f32 %v1184_v49, %v1182_v54 }
 0xb15   :  { %v1188_v57 = vmax.f32 %v1186_v56, 0.0 }
 0xb17   :  { %v1192_v59 = vsel %vm109_vm0, %v1188_v57, 0.0 }
 0xb18   :  { %v1193_v60 = vadd.f32 %v1192_v59, %v1191_v58 }
 0xb1a   :  { %v1194_v61 = vrot.slane %v1193_v60, 4 }
 0xb1c   :  { %v1195_v62 = vadd.f32 %v1194_v61, %v1193_v60 }
 0xb1e   :  { %v1196_v63 = vrot.slane %v1195_v62, 2 }
 0xb20   :  { %v1197_v0 = vadd.f32 %v1196_v63, %v1195_v62 }
 0xb22   :  { %v1198_v1 = vrot.slane %v1197_v0, 1 }
 0xb24   :  { %v1199_v2 = vadd.f32 %v1198_v1, %v1197_v0 }
 0xb26   :  { %v1200_v3 = vmul.f32 %v1199_v2, %v2297_v16 }
 0xb28   :  { %v1201_v4 = vsub.f32 %v1187_v55, %v1200_v3  ;;  %v1202_v5 = vsub.f32 %v1188_v57, %v1200_v3 }
 0xb2a   :  { %v1203_v6 = vmul.f32 %v1201_v4, %v1201_v4  ;;  %v1204_v7 = vmul.f32 %v1202_v5, %v1202_v5 }
 0xb2c   :  { %v1205_v8 = vsel %vm109_vm0, %v1203_v6, 0.0  ;;  %v1206_v9 = vsel %vm109_vm0, %v1204_v7, 0.0 }
 0xb2d   :  { %v1207_v10 = vadd.f32 %v1206_v9, %v1205_v8 }
 0xb2f   :  { %v1208_v11 = vrot.slane %v1207_v10, 4 }
 0xb31   :  { %v1209_v13 = vadd.f32 %v1208_v11, %v1207_v10  ;;  %v2036_v10 = vld [vmem:[#allocation8 + $0x98] sm:$0xff] }
 0xb33   :  { %v1210_v14 = vrot.slane %v1209_v13, 2 }
 0xb35   :  { %v1211_v17 = vadd.f32 %v1210_v14, %v1209_v13  ;;  %v2035_v13 = vld [vmem:[#allocation8 + $0x90] sm:$0xff] }
 0xb37   :  { %v1212_v18 = vrot.slane %v1211_v17, 1 }
 0xb39   :  { %v1213_v19 = vadd.f32 %v1212_v18, %v1211_v17 }
 0xb3b   :  { %v1214_v20 = vmul.f32 %v1213_v19, %v2297_v16 }
 0xb3d   :  { %v1215_v21 = vadd.f32 1e-05, %v1214_v20 }
 0xb3f   :  { %2074 = vrsqrt.f32 %v1215_v21  ;;  %vm1222_vm14 = vweird.f32 %v1215_v21 }
 0xb45   :  { %v2075_v22 = vpop.eup %2074 }
 0xb46   :  { %v1217_v23 = vmul.f32 %v2075_v22, %v1215_v21  ;;  %vm1223_vm13 = vweird.f32 %v2075_v22 }
 0xb47   :  { %vm1224_vm15 = vmor %vm1222_vm14, %vm1223_vm13 }
 0xb48   :  { %v1218_v24 = vmul.f32 %v2075_v22, %v1217_v23 }
 0xb4a   :  { %v1219_v25 = vmul.f32 0.5, %v1218_v24  ;;  %v1324_v24 = vld [vmem:[#allocation10 + $0x24] sm:$0x7] }
 0xb4c   :  { %v1220_v27 = vsub.f32 1.5, %v1219_v25 }
 0xb4e   :  { %v1221_v28 = vmul.f32 %v2075_v22, %v1220_v27  ;;  %v1362_v27 = vperm.slane %v1324_v24, 0 }
 0xb50   :  { %v1225_v30 = vsel %vm1224_vm15, %v2075_v22, %v1221_v28 }
 0xb51   :  { %v1226_v31 = vmul.f32 %v1225_v30, %v1201_v4  ;;  %v1227_v32 = vmul.f32 %v1225_v30, %v1202_v5 }
 0xb53   :  { %v1229_v34 = vmul.f32 %v1228_v29, %v1226_v31  ;;  %v1230_v35 = vmul.f32 %v1228_v29, %v1227_v32  ;;  %v1365_v31 = vperm.slane %v1324_v24, 1 }
 0xb55   :  { %v1232_v36 = vadd.f32 %v1231_v33, %v1229_v34  ;;  %v1233_v37 = vadd.f32 %v1231_v33, %v1230_v35 }
 0xb57   :  { %v1234_v38 = vpack.c.bf16 %v1233_v37, %v1232_v36  ;;  %v2034_v37 = vld [vmem:[#allocation7 + $0x98] sm:$0xff] }
 0xb58   :  { %1444 = vmatpush.bf16.msrb.mxu3 %v2034_v37 }
 0xb59   :  { %1242 = vmatpush.bf16.msra.mxu0 %v1234_v38  ;;  %1929 = vmatmul.msk.bf16.vlgmr.msra.gmra.mxu3 %vm109_vm0, %v1234_v38  ;;  %v2033_v38 = vld [vmem:[#allocation7 + $0x90] sm:$0xff] }
 0xb5c   :  { %1920 = vmatmul.msk.bf16.vlgmr.msra.gmra.mxu0 %vm161_vm5, %v2303_v53  ;;  %1445 = vmatpush.bf16.msrb.mxu3 %v2033_v38 }
 0xb5d   :  { %1415 = vmatpush.bf16.msrb.mxu0 %v2036_v10 }
 0xb61   :  { %1416 = vmatpush.bf16.msrb.mxu0 %v2035_v13 }
 0xbd9   :  { %v1244_v41 = vpop.f32.mrf.mxu0 }
 0xbdc   :  { %v1284_v44 = vpop.f32.mrf.mxu3 }
 0xbe1   :  { %v1246_v42 = vpop.f32.mrf.mxu0 }
 0xbe2   :  { %v1249_v43 = vpack.c.bf16 %v1246_v42, %v1244_v41 }
 0xbe4   :  { %1938 = vmatmul.msk.bf16.vlgmr.msra.gmra.mxu1 %vm109_vm0, %v1249_v43  ;;  %v1286_v49 = vpop.f32.mrf.mxu3 }
 0xc61   :  { %v1313_v45 = vpop.f32.mrf.mxu1 }
 0xc62   :  { %v1314_v46 = vadd.f32 %v1313_v45, %v1284_v44  ;;  %v1452_v45 = vperm.slane %v1324_v24, 2 }
 0xc64   :  { %v1319_v48 = vadd.f32 %v1318_v47, %v1314_v46 }
 0xc66   :  { %v1321_v52 = vmax.f32 %v1319_v48, 0.0 }
 0xc68   :  { %v1325_v56 = vsel %vm109_vm0, %v1321_v52, 0.0 }
 0xc69   :  { %v1315_v50 = vpop.f32.mrf.mxu1 }
 0xc6a   :  { %v1316_v51 = vadd.f32 %v1315_v50, %v1286_v49 }
 0xc6c   :  { %v1320_v54 = vadd.f32 %v1318_v47, %v1316_v51 }
 0xc6e   :  { %v1322_v55 = vmax.f32 %v1320_v54, 0.0 }
 0xc70   :  { %v1326_v57 = vsel %vm109_vm0, %v1322_v55, 0.0 }
 0xc71   :  { %v1327_v58 = vadd.f32 %v1326_v57, %v1325_v56 }
 0xc73   :  { %v1328_v59 = vrot.slane %v1327_v58, 4 }
 0xc75   :  { %v1329_v60 = vadd.f32 %v1328_v59, %v1327_v58 }
 0xc77   :  { %v1330_v61 = vrot.slane %v1329_v60, 2 }
 0xc79   :  { %v1331_v62 = vadd.f32 %v1330_v61, %v1329_v60 }
 0xc7b   :  { %v1332_v63 = vrot.slane %v1331_v62, 1 }
 0xc7d   :  { %v1333_v0 = vadd.f32 %v1332_v63, %v1331_v62 }
 0xc7f   :  { %v1334_v1 = vmul.f32 %v1333_v0, %v2297_v16 }
 0xc81   :  { %v1335_v2 = vsub.f32 %v1321_v52, %v1334_v1  ;;  %v1336_v3 = vsub.f32 %v1322_v55, %v1334_v1 }
 0xc83   :  { %v1337_v4 = vmul.f32 %v1335_v2, %v1335_v2  ;;  %v1338_v5 = vmul.f32 %v1336_v3, %v1336_v3 }
 0xc85   :  { %v1339_v6 = vsel %vm109_vm0, %v1337_v4, 0.0  ;;  %v1340_v7 = vsel %vm109_vm0, %v1338_v5, 0.0 }
 0xc86   :  { %v1341_v8 = vadd.f32 %v1340_v7, %v1339_v6 }
 0xc88   :  { %v1342_v9 = vrot.slane %v1341_v8, 4 }
 0xc8a   :  { %v1343_v11 = vadd.f32 %v1342_v9, %v1341_v8  ;;  %v2040_v8 = vld [vmem:[#allocation8 + $0xa8] sm:$0xff] }
 0xc8c   :  { %v1344_v12 = vrot.slane %v1343_v11, 2 }
 0xc8e   :  { %v1345_v14 = vadd.f32 %v1344_v12, %v1343_v11  ;;  %v2039_v11 = vld [vmem:[#allocation8 + $0xa0] sm:$0xff] }
 0xc90   :  { %v1346_v15 = vrot.slane %v1345_v14, 1 }
 0xc92   :  { %v1347_v17 = vadd.f32 %v1346_v15, %v1345_v14 }
 0xc94   :  { %v1348_v18 = vmul.f32 %v1347_v17, %v2297_v16 }
 0xc96   :  { %v1349_v19 = vadd.f32 1e-05, %v1348_v18 }
 0xc98   :  { %2076 = vrsqrt.f32 %v1349_v19  ;;  %vm1356_vm2 = vweird.f32 %v1349_v19 }
 0xc9e   :  { %v2077_v20 = vpop.eup %2076 }
 0xc9f   :  { %v1351_v21 = vmul.f32 %v2077_v20, %v1349_v19  ;;  %vm1357_vm1 = vweird.f32 %v2077_v20 }
 0xca0   :  { %vm1358_vm3 = vmor %vm1356_vm2, %vm1357_vm1 }
 0xca1   :  { %v1352_v22 = vmul.f32 %v2077_v20, %v1351_v21 }
 0xca3   :  { %v1353_v23 = vmul.f32 0.5, %v1352_v22  ;;  %v1458_v22 = vld [vmem:[#allocation10 + $0x28] sm:$0x7] }
 0xca5   :  { %v1354_v25 = vsub.f32 1.5, %v1353_v23 }
 0xca7   :  { %v1355_v26 = vmul.f32 %v2077_v20, %v1354_v25  ;;  %v1496_v25 = vperm.slane %v1458_v22, 0 }
 0xca9   :  { %v1359_v28 = vsel %vm1358_vm3, %v2077_v20, %v1355_v26 }
 0xcaa   :  { %v1360_v29 = vmul.f32 %v1359_v28, %v1335_v2  ;;  %v1361_v30 = vmul.f32 %v1359_v28, %v1336_v3 }
 0xcac   :  { %v1363_v32 = vmul.f32 %v1362_v27, %v1360_v29  ;;  %v1364_v33 = vmul.f32 %v1362_v27, %v1361_v30  ;;  %v1499_v29 = vperm.slane %v1458_v22, 1 }
 0xcae   :  { %v1366_v34 = vadd.f32 %v1365_v31, %v1363_v32  ;;  %v1367_v35 = vadd.f32 %v1365_v31, %v1364_v33 }
 0xcb0   :  { %v1368_v36 = vpack.c.bf16 %v1367_v35, %v1366_v34  ;;  %v2038_v35 = vld [vmem:[#allocation7 + $0xa8] sm:$0xff] }
 0xcb1   :  { %1578 = vmatpush.bf16.msra.mxu0 %v2038_v35 }
 0xcb2   :  { %1376 = vmatpush.bf16.msra.mxu2 %v1368_v36  ;;  %1948 = vmatmul.msk.bf16.vlgmr.msrb.gmra.mxu0 %vm109_vm0, %v1368_v36  ;;  %v2037_v36 = vld [vmem:[#allocation7 + $0xa0] sm:$0xff] }
 0xcb5   :  { %1939 = vmatmul.msk.bf16.vlgmr.msra.gmra.mxu2 %vm161_vm5, %v2303_v53  ;;  %1579 = vmatpush.bf16.msra.mxu0 %v2037_v36 }
 0xcb6   :  { %1549 = vmatpush.bf16.msrb.mxu2 %v2040_v8 }
 0xcba   :  { %1550 = vmatpush.bf16.msrb.mxu2 %v2039_v11 }
 0xd2f   :  { %v1418_v42 = vpop.f32.mrf.mxu0 }
 0xd37   :  { %v1420_v47 = vpop.f32.mrf.mxu0 }
 0xd38   :  { %v1378_v39 = vpop.f32.mrf.mxu2 }
 0xd40   :  { %v1380_v40 = vpop.f32.mrf.mxu2 }
 0xd41   :  { %v1383_v41 = vpack.c.bf16 %v1380_v40, %v1378_v39 }
 0xd43   :  { %1957 = vmatmul.msk.bf16.vlgmr.msrb.gmra.mxu3 %vm109_vm0, %v1383_v41 }
 0xdc6   :  { %v1447_v43 = vpop.f32.mrf.mxu3 }
 0xdc7   :  { %v1448_v44 = vadd.f32 %v1447_v43, %v1418_v42  ;;  %v1586_v43 = vperm.slane %v1458_v22, 2 }
 0xdc9   :  { %v1453_v46 = vadd.f32 %v1452_v45, %v1448_v44 }
 0xdcb   :  { %v1455_v50 = vmax.f32 %v1453_v46, 0.0 }
 0xdcd   :  { %v1459_v54 = vsel %vm109_vm0, %v1455_v50, 0.0 }
 0xdce   :  { %v1449_v48 = vpop.f32.mrf.mxu3 }
 0xdcf   :  { %v1450_v49 = vadd.f32 %v1449_v48, %v1420_v47 }
 0xdd1   :  { %v1454_v51 = vadd.f32 %v1452_v45, %v1450_v49 }
 0xdd3   :  { %v1456_v52 = vmax.f32 %v1454_v51, 0.0 }
 0xdd5   :  { %v1460_v55 = vsel %vm109_vm0, %v1456_v52, 0.0 }
 0xdd6   :  { %v1461_v56 = vadd.f32 %v1460_v55, %v1459_v54 }
 0xdd8   :  { %v1462_v57 = vrot.slane %v1461_v56, 4 }
 0xdda   :  { %v1463_v58 = vadd.f32 %v1462_v57, %v1461_v56 }
 0xddc   :  { %v1464_v59 = vrot.slane %v1463_v58, 2 }
 0xdde   :  { %v1465_v60 = vadd.f32 %v1464_v59, %v1463_v58 }
 0xde0   :  { %v1466_v61 = vrot.slane %v1465_v60, 1 }
 0xde2   :  { %v1467_v62 = vadd.f32 %v1466_v61, %v1465_v60 }
 0xde4   :  { %v1468_v63 = vmul.f32 %v1467_v62, %v2297_v16 }
 0xde6   :  { %v1469_v0 = vsub.f32 %v1455_v50, %v1468_v63  ;;  %v1470_v1 = vsub.f32 %v1456_v52, %v1468_v63 }
 0xde8   :  { %v1471_v2 = vmul.f32 %v1469_v0, %v1469_v0  ;;  %v1472_v3 = vmul.f32 %v1470_v1, %v1470_v1 }
 0xdea   :  { %v1473_v4 = vsel %vm109_vm0, %v1471_v2, 0.0  ;;  %v1474_v5 = vsel %vm109_vm0, %v1472_v3, 0.0 }
 0xdeb   :  { %v1475_v6 = vadd.f32 %v1474_v5, %v1473_v4 }
 0xded   :  { %v1476_v7 = vrot.slane %v1475_v6, 4 }
 0xdef   :  { %v1477_v9 = vadd.f32 %v1476_v7, %v1475_v6  ;;  %v2044_v6 = vld [vmem:[#allocation8 + $0xb8] sm:$0xff] }
 0xdf1   :  { %v1478_v10 = vrot.slane %v1477_v9, 2 }
 0xdf3   :  { %v1479_v12 = vadd.f32 %v1478_v10, %v1477_v9  ;;  %v2043_v9 = vld [vmem:[#allocation8 + $0xb0] sm:$0xff] }
 0xdf5   :  { %v1480_v13 = vrot.slane %v1479_v12, 1 }
 0xdf7   :  { %v1481_v14 = vadd.f32 %v1480_v13, %v1479_v12 }
 0xdf9   :  { %v1482_v15 = vmul.f32 %v1481_v14, %v2297_v16 }
 0xdfb   :  { %v1483_v17 = vadd.f32 1e-05, %v1482_v15 }
 0xdfd   :  { %2078 = vrsqrt.f32 %v1483_v17  ;;  %vm1490_vm6 = vweird.f32 %v1483_v17 }
 0xe03   :  { %v2079_v18 = vpop.eup %2078 }
 0xe04   :  { %v1485_v19 = vmul.f32 %v2079_v18, %v1483_v17  ;;  %vm1491_vm4 = vweird.f32 %v2079_v18 }
 0xe05   :  { %vm1492_vm7 = vmor %vm1490_vm6, %vm1491_vm4 }
 0xe06   :  { %v1486_v20 = vmul.f32 %v2079_v18, %v1485_v19 }
 0xe08   :  { %v1487_v21 = vmul.f32 0.5, %v1486_v20  ;;  %v1592_v20 = vld [vmem:[#allocation10 + $0x2c] sm:$0x7] }
 0xe0a   :  { %v1488_v23 = vsub.f32 1.5, %v1487_v21 }
 0xe0c   :  { %v1489_v24 = vmul.f32 %v2079_v18, %v1488_v23  ;;  %v1630_v23 = vperm.slane %v1592_v20, 0 }
 0xe0e   :  { %v1493_v26 = vsel %vm1492_vm7, %v2079_v18, %v1489_v24 }
 0xe0f   :  { %v1494_v27 = vmul.f32 %v1493_v26, %v1469_v0  ;;  %v1495_v28 = vmul.f32 %v1493_v26, %v1470_v1 }
 0xe11   :  { %v1497_v30 = vmul.f32 %v1496_v25, %v1494_v27  ;;  %v1498_v31 = vmul.f32 %v1496_v25, %v1495_v28  ;;  %v1633_v27 = vperm.slane %v1592_v20, 1 }
 0xe13   :  { %v1500_v32 = vadd.f32 %v1499_v29, %v1497_v30  ;;  %v1501_v33 = vadd.f32 %v1499_v29, %v1498_v31 }
 0xe15   :  { %v1502_v34 = vpack.c.bf16 %v1501_v33, %v1500_v32  ;;  %v2042_v32 = vld [vmem:[#allocation7 + $0xb8] sm:$0xff]  ;;  %v2041_v33 = vld [vmem:[#allocation7 + $0xb0] sm:$0xff] }
 0xe16   :  { %1712 = vmatpush.bf16.msra.mxu2 %v2042_v32 }
 0xe17   :  { %1510 = vmatpush.bf16.msrb.mxu1 %v1502_v34  ;;  %1967 = vmatmul.msk.bf16.vlgmr.msrb.gmra.mxu2 %vm109_vm0, %v1502_v34 }
 0xe1a   :  { %1958 = vmatmul.msk.bf16.vlgmr.msrb.gmra.mxu1 %vm161_vm5, %v2303_v53  ;;  %1713 = vmatpush.bf16.msra.mxu2 %v2041_v33 }
 0xe1b   :  { %1683 = vmatpush.bf16.msra.mxu1 %v2044_v6 }
 0xe1f   :  { %1684 = vmatpush.bf16.msra.mxu1 %v2043_v9 }
 0xe97   :  { %v1512_v37 = vpop.f32.mrf.mxu1 }
 0xe9a   :  { %v1552_v40 = vpop.f32.mrf.mxu2 }
 0xe9f   :  { %v1514_v38 = vpop.f32.mrf.mxu1 }
 0xea0   :  { %v1517_v39 = vpack.c.bf16 %v1514_v38, %v1512_v37 }
 0xea2   :  { %1976 = vmatmul.msk.bf16.vlgmr.msra.gmra.mxu0 %vm109_vm0, %v1517_v39  ;;  %v1554_v45 = vpop.f32.mrf.mxu2 }
 0xf1f   :  { %v1581_v41 = vpop.f32.mrf.mxu0 }
 0xf20   :  { %v1582_v42 = vadd.f32 %v1581_v41, %v1552_v40 }
 0xf22   :  { %v1587_v44 = vadd.f32 %v1586_v43, %v1582_v42  ;;  %v1720_v42 = vperm.slane %v1592_v20, 2 }
 0xf24   :  { %v1589_v48 = vmax.f32 %v1587_v44, 0.0 }
 0xf26   :  { %v1593_v51 = vsel %vm109_vm0, %v1589_v48, 0.0 }
 0xf27   :  { %v1583_v46 = vpop.f32.mrf.mxu0 }
 0xf28   :  { %v1584_v47 = vadd.f32 %v1583_v46, %v1554_v45 }
 0xf2a   :  { %v1588_v49 = vadd.f32 %v1586_v43, %v1584_v47 }
 0xf2c   :  { %v1590_v50 = vmax.f32 %v1588_v49, 0.0 }
 0xf2e   :  { %v1594_v52 = vsel %vm109_vm0, %v1590_v50, 0.0 }
 0xf2f   :  { %v1595_v54 = vadd.f32 %v1594_v52, %v1593_v51 }
 0xf31   :  { %v1596_v55 = vrot.slane %v1595_v54, 4 }
 0xf33   :  { %v1597_v56 = vadd.f32 %v1596_v55, %v1595_v54 }
 0xf35   :  { %v1598_v57 = vrot.slane %v1597_v56, 2 }
 0xf37   :  { %v1599_v58 = vadd.f32 %v1598_v57, %v1597_v56 }
 0xf39   :  { %v1600_v59 = vrot.slane %v1599_v58, 1 }
 0xf3b   :  { %v1601_v60 = vadd.f32 %v1600_v59, %v1599_v58 }
 0xf3d   :  { %v1602_v61 = vmul.f32 %v1601_v60, %v2297_v16 }
 0xf3f   :  { %v1603_v62 = vsub.f32 %v1589_v48, %v1602_v61  ;;  %v1604_v63 = vsub.f32 %v1590_v50, %v1602_v61 }
 0xf41   :  { %v1605_v0 = vmul.f32 %v1603_v62, %v1603_v62  ;;  %v1606_v1 = vmul.f32 %v1604_v63, %v1604_v63 }
 0xf43   :  { %v1607_v2 = vsel %vm109_vm0, %v1605_v0, 0.0  ;;  %v1608_v3 = vsel %vm109_vm0, %v1606_v1, 0.0 }
 0xf44   :  { %v1609_v4 = vadd.f32 %v1608_v3, %v1607_v2 }
 0xf46   :  { %v1610_v5 = vrot.slane %v1609_v4, 4 }
 0xf48   :  { %v1611_v7 = vadd.f32 %v1610_v5, %v1609_v4 }
 0xf4a   :  { %v1612_v8 = vrot.slane %v1611_v7, 2 }
 0xf4c   :  { %v1613_v10 = vadd.f32 %v1612_v8, %v1611_v7 }
 0xf4e   :  { %v1614_v11 = vrot.slane %v1613_v10, 1 }
 0xf50   :  { %v1615_v12 = vadd.f32 %v1614_v11, %v1613_v10 }
 0xf52   :  { %v1616_v13 = vmul.f32 %v1615_v12, %v2297_v16 }
 0xf54   :  { %v1617_v14 = vadd.f32 1e-05, %v1616_v13 }
 0xf56   :  { %2080 = vrsqrt.f32 %v1617_v14  ;;  %vm1624_vm9 = vweird.f32 %v1617_v14 }
 0xf5c   :  { %v2081_v15 = vpop.eup %2080 }
 0xf5d   :  { %v1619_v17 = vmul.f32 %v2081_v15, %v1617_v14  ;;  %vm1625_vm8 = vweird.f32 %v2081_v15 }
 0xf5e   :  { %vm1626_vm10 = vmor %vm1624_vm9, %vm1625_vm8 }
 0xf5f   :  { %v1620_v18 = vmul.f32 %v2081_v15, %v1619_v17 }
 0xf61   :  { %v1621_v19 = vmul.f32 0.5, %v1620_v18 }
 0xf63   :  { %v1622_v21 = vsub.f32 1.5, %v1621_v19 }
 0xf65   :  { %v1623_v22 = vmul.f32 %v2081_v15, %v1622_v21 }
 0xf67   :  { %v1627_v24 = vsel %vm1626_vm10, %v2081_v15, %v1623_v22 }
 0xf68   :  { %v1628_v25 = vmul.f32 %v1627_v24, %v1603_v62  ;;  %v1629_v26 = vmul.f32 %v1627_v24, %v1604_v63 }
 0xf6a   :  { %v1631_v28 = vmul.f32 %v1630_v23, %v1628_v25  ;;  %v1632_v29 = vmul.f32 %v1630_v23, %v1629_v26 }
 0xf6c   :  { %v1634_v16 = vadd.f32 %v1633_v27, %v1631_v28  ;;  %v1635_v30 = vadd.f32 %v1633_v27, %v1632_v29 }
 0xf6e   :  { %v1636_v31 = vpack.c.bf16 %v1635_v30, %v1634_v16 }
 0xf70   :  { %1644 = vmatpush.bf16.msra.mxu3 %v1636_v31  ;;  %1986 = vmatmul.msk.bf16.vlgmr.msra.gmra.mxu1 %vm109_vm0, %v1636_v31 }
 0xf73   :  { %1977 = vmatmul.msk.bf16.vlgmr.msra.gmra.mxu3 %vm161_vm5, %v2303_v53  ;;  %v1723_v53 = vld [vmem:[%s2431_s5] sm:$0x3] }
 0xfed   :  { %v1686_v37 = vpop.f32.mrf.mxu1 }
 0xff5   :  { %v1688_v39 = vpop.f32.mrf.mxu1 }
 0xff6   :  { %v1646_v34 = vpop.f32.mrf.mxu3 }
 0xffe   :  { %v1648_v35 = vpop.f32.mrf.mxu3 }
 0xfff   :  { %v1651_v36 = vpack.c.bf16 %v1648_v35, %v1646_v34 }
0x1001   :  { %1995 = vmatmul.msk.bf16.vlgmr.msra.gmra.mxu2 %vm109_vm0, %v1651_v36  ;;  %vm1747_vm0 = vcmask 254976  }
0x1084   :  { %v1715_v38 = vpop.f32.mrf.mxu2 }
0x1085   :  { %v1716_v41 = vadd.f32 %v1715_v38, %v1686_v37 }
0x1087   :  { %v1721_v45 = vadd.f32 %v1720_v42, %v1716_v41 }
0x108c   :  { %v1717_v40 = vpop.f32.mrf.mxu2 }
0x108d   :  { %v1718_v43 = vadd.f32 %v1717_v40, %v1688_v39 }
0x108f   :  { %v1722_v44 = vadd.f32 %v1720_v42, %v1718_v43 }
0x1091   :  { %1741 = vmatpush.msrb.mxu0 %v1722_v44 }
0x1093   :  { %1742 = vmatpush.msrb.mxu0 %v1721_v45 }
0x1094   :  { %1996 = vmatmul.msk.f32.vlgmr.msrb.gmra.mxu0 %vm161_vm5, %v1723_v53 }
0x1111   :  { %v1744_v46 = vpop.f32.mrf.mxu0 }
0x1112   :  { %1748 = vst.msk [vmem:[#allocation11] sm:$0x3] %vm1747_vm0, %v1744_v46 }
0x1113   :  { %1759 = dma.vmem_to_hbm [thread:$0]  %s1755_s24, 32, %s1757_s27, [#allocation4]  }
0x1114   :  { %2232 = dma.done.wait [#allocation4], 32  }
0x1115   :  { %2233 = vsyncadd [#allocation4], 4294967264 }
0x1116   :  { %1764 = vsyncpa [#allocation3], 1 }
0x1117   :  { %1765 = vsyncpa [#allocation6], 1 }
0x1118   :  { %1766 = vsyncpa [#allocation9], 1 }
0x1119   :  { %1767 = vsyncpa [#allocation4], 1 }

</bundles_post_ra>
